<compile_context>
chip_gen: v7x
topology: tpu7x:2x2x1
jax: 0.10.0
libtpu: 0.0.40
codegen_flags: <defaults>
</compile_context>

<pallas_src>
import jax
import jax.numpy as jnp
from jax.experimental import pallas as pl
from jax.experimental.pallas import tpu as pltpu

# ---------------- small, forward-consistent dimensions ----------------
NUM_SPARSE_TOKENS = 32
NUM_PROG_TOKENS = 16
NUM_CAND_TOKENS = 16
S_SPARSE, S_NUMERIC, S_PROG, S_CAND = 4, 2, 4, 6
SEQ = S_SPARSE + S_NUMERIC + S_PROG + S_CAND           # 16
DIM = 32                                               # hidden size
NUM_HEADS = 2
HEAD_DIM = DIM // NUM_HEADS                            # 16
FFN_DIM = 64
NUM_LAYERS = 2
DEC_HIDDEN = 32
LN_EPS = 1e-5
# TODO(synk): DIM stays 32 (lane under-utilization); padding to 128 lanes is a
# model-boundary layout change we deliberately do not make here.


def _layer_norm(x, gamma, beta):
    mean = jnp.mean(x, axis=-1, keepdims=True)
    var = jnp.mean((x - mean) ** 2, axis=-1, keepdims=True)
    return (x - mean) * jax.lax.rsqrt(var + LN_EPS) * gamma + beta


# ---------------- single fused Pallas kernel ----------------
def fused_model_kernel(x_ref,                       # (B*SEQ, DIM) embedded tokens
                       wqkv_ref, bqkv_ref,          # (L, DIM, 3*DIM), (L, 1, 3*DIM)
                       wo_ref,                      # (L, DIM, DIM)
                       w1_ref, b1_ref,              # (L, DIM, FFN_DIM), (L, 1, FFN_DIM)
                       w2_ref,                      # (L, FFN_DIM, DIM)
                       vec_ref,                     # (L, 6, DIM): bo, bf2, g1, be1, g2, be2
                       dw1_ref, db1_ref,            # (DIM, DEC_HIDDEN), (1, DEC_HIDDEN)
                       dw2_ref, db2_ref,            # (DEC_HIDDEN, 1), (1, 1)
                       score_ref):                  # (B*S_CAND, 1)
    rows = x_ref.shape[0]
    batch = rows // SEQ
    x = x_ref[...]                                                    # (rows, DIM)
    scale = 1.0 / (HEAD_DIM ** 0.5)

    # TODO(synk): dropout omitted (treated as p=0, deterministic forward).
    for l in range(NUM_LAYERS):                     # static unroll (NUM_LAYERS == 2)
        wqkv = wqkv_ref[l]
        bqkv = bqkv_ref[l]
        wo = wo_ref[l]
        w1 = w1_ref[l]
        b1 = b1_ref[l]
        w2 = w2_ref[l]
        vec = vec_ref[l]                            # rows: bo, bf2, g1, be1, g2, be2
        bo, bf2 = vec[0:1, :], vec[1:2, :]
        g1, be1 = vec[2:3, :], vec[3:4, :]
        g2, be2 = vec[4:5, :], vec[5:6, :]

        # fused QKV projection over all batch rows at once -> one MXU pass
        qkv = jnp.dot(x, wqkv, preferred_element_type=jnp.float32) + bqkv

        # multi-head attention; head outputs accumulated through row-slices of
        # wo (no lane-axis concatenate of head activations).
        attn = jnp.zeros((rows, DIM), jnp.float32)
        for h in range(NUM_HEADS):                  # static unroll
            q_off = h * HEAD_DIM
            k_off = DIM + h * HEAD_DIM
            v_off = 2 * DIM + h * HEAD_DIM
            head_rows = []
            for b in range(batch):                  # static unroll; SEQxSEQ per batch
                r0 = b * SEQ
                qh = qkv[r0:r0 + SEQ, q_off:q_off + HEAD_DIM]
                kh = qkv[r0:r0 + SEQ, k_off:k_off + HEAD_DIM]
                vh = qkv[r0:r0 + SEQ, v_off:v_off + HEAD_DIM]
                s = jnp.dot(qh, kh.T, preferred_element_type=jnp.float32) * scale
                p = jax.nn.softmax(s, axis=-1)
                head_rows.append(jnp.dot(p, vh, preferred_element_type=jnp.float32))
            head_out = jnp.concatenate(head_rows, axis=0)             # (rows, HEAD_DIM)
            attn = attn + jnp.dot(head_out, wo[q_off:q_off + HEAD_DIM, :],
                                  preferred_element_type=jnp.float32)
        attn = attn + bo

        x1 = _layer_norm(x + attn, g1, be1)
        ff = jnp.dot(x1, w1, preferred_element_type=jnp.float32) + b1
        ff = jnp.maximum(ff, 0.0)
        ff = jnp.dot(ff, w2, preferred_element_type=jnp.float32) + bf2
        x = _layer_norm(x1 + ff, g2, be2)

    # ---- decoder head fused as epilogue: score every candidate token ----
    cand = jnp.concatenate(
        [x[b * SEQ + SEQ - S_CAND:(b + 1) * SEQ, :] for b in range(batch)], axis=0)
    hdec = jnp.dot(cand, dw1_ref[...], preferred_element_type=jnp.float32) + db1_ref[...]
    hdec = jnp.maximum(hdec, 0.0)
    score_ref[...] = (jnp.dot(hdec, dw2_ref[...], preferred_element_type=jnp.float32)
                      + db2_ref[...])


# ---------------- pallas_call wrapper ----------------
def fused_forward(enc_params, dec_params, h0):
    """h0: (B, SEQ, DIM) embedded tokens -> (B, S_CAND) candidate scores."""
    B = h0.shape[0]
    x2d = h0.reshape(B * SEQ, DIM)
    operands = (x2d,
                enc_params['w_qkv'], enc_params['b_qkv'], enc_params['wo'],
                enc_params['w1'], enc_params['b1'], enc_params['w2'],
                enc_params['vec'],
                dec_params['w1'], dec_params['b1'],
                dec_params['w2'], dec_params['b2'])
    vmem = pltpu.MemorySpace.VMEM
    scores = pl.pallas_call(
        fused_model_kernel,
        out_shape=jax.ShapeDtypeStruct((B * S_CAND, 1), jnp.float32),
        in_specs=[pl.BlockSpec(memory_space=vmem) for _ in operands],
        out_specs=pl.BlockSpec(memory_space=vmem),
    )(*operands)
    return scores.reshape(B, S_CAND)


# ---------------- parameter construction (deterministic) ----------------
def _normal(key, shape, scale=0.02):
    return scale * jax.random.normal(key, shape, dtype=jnp.float32)


def init_encoder_params(key):
    keys = jax.random.split(key, 6 + NUM_LAYERS)
    params = {
        'emb_sparse': _normal(keys[0], (NUM_SPARSE_TOKENS, DIM)),
        'emb_prog':   _normal(keys[1], (NUM_PROG_TOKENS, DIM)),
        'emb_cand':   _normal(keys[2], (NUM_CAND_TOKENS, DIM)),
        'w_numeric':  _normal(keys[3], (S_NUMERIC, DIM)),
        'b_numeric':  _normal(keys[4], (S_NUMERIC, DIM)),
        'pos':        _normal(keys[5], (SEQ, DIM)),
    }
    wqkv, bqkv, wo, w1, b1, w2, vec = [], [], [], [], [], [], []
    for l in range(NUM_LAYERS):
        lk = jax.random.split(keys[6 + l], 8)
        wqkv.append(jnp.concatenate([_normal(lk[0], (DIM, DIM)),
                                     _normal(lk[1], (DIM, DIM)),
                                     _normal(lk[2], (DIM, DIM))], axis=1))
        bqkv.append(jnp.zeros((1, 3 * DIM), jnp.float32))
        wo.append(_normal(lk[3], (DIM, DIM)))
        w1.append(_normal(lk[4], (DIM, FFN_DIM)))
        b1.append(jnp.zeros((1, FFN_DIM), jnp.float32))
        w2.append(_normal(lk[5], (FFN_DIM, DIM)))
        vec.append(jnp.stack([jnp.zeros((DIM,), jnp.float32),   # bo
                              jnp.zeros((DIM,), jnp.float32),   # bf2
                              jnp.ones((DIM,), jnp.float32),    # gamma1
                              jnp.zeros((DIM,), jnp.float32),   # beta1
                              jnp.ones((DIM,), jnp.float32),    # gamma2
                              jnp.zeros((DIM,), jnp.float32)])) # beta2
    params.update({
        'w_qkv': jnp.stack(wqkv), 'b_qkv': jnp.stack(bqkv),
        'wo': jnp.stack(wo),
        'w1': jnp.stack(w1), 'b1': jnp.stack(b1), 'w2': jnp.stack(w2),
        'vec': jnp.stack(vec),
    })
    return params


def init_decoder_params(key):
    k1, k2 = jax.random.split(key)
    return {
        'w1': _normal(k1, (DIM, DEC_HIDDEN)), 'b1': jnp.zeros((1, DEC_HIDDEN), jnp.float32),
        'w2': _normal(k2, (DEC_HIDDEN, 1)),   'b2': jnp.zeros((1, 1), jnp.float32),
    }


# ---------------- embedding front-end (plain-JAX glue, gathers) ----------------
def embed_inputs(params, feats):
    sparse, numeric, progression, candidates = feats
    e_sp = jnp.take(params['emb_sparse'], sparse, axis=0)                  # (B,Ssp,D)
    e_nu = numeric[..., None] * params['w_numeric'] + params['b_numeric']  # (B,Snu,D)
    e_pr = jnp.take(params['emb_prog'], progression, axis=0)               # (B,Spr,D)
    e_cd = jnp.take(params['emb_cand'], candidates, axis=0)                # (B,Scd,D)
    return jnp.concatenate([e_sp, e_nu, e_pr, e_cd], axis=1) + params['pos'][None]


# ---------------- Model ----------------
class Model:
    def __init__(self, encoder_params, decoder_params, *, freeze_encoder: bool) -> None:
        self._encoder = encoder_params
        self._decoder = decoder_params
        self._freeze_encoder = freeze_encoder
        self._mode = 'training'

    def mode(self, mode: str) -> None:
        if mode not in ('training', 'validation', 'prediction'):
            raise ValueError(mode)
        self._mode = mode

    def __call__(self, x):
        if self._mode == 'prediction':
            feats, index = x, None
        else:
            feats, index = x[:-1], x[-1]

        enc_params = self._encoder
        h0 = embed_inputs(enc_params, feats)                               # (B,SEQ,D)
        if self._freeze_encoder and self._mode != 'prediction':
            # torch.no_grad analogue: forward identical, grads into the
            # encoder (embeddings + layer weights) blocked.
            h0 = jax.lax.stop_gradient(h0)
            enc_params = jax.tree_util.tree_map(jax.lax.stop_gradient, enc_params)

        scores = fused_forward(enc_params, self._decoder, h0)              # (B,S_CAND)
        if self._mode == 'prediction':
            return scores
        # training/validation: x[-1] selects the labelled candidate's score
        return jnp.take_along_axis(scores, index[:, None].astype(jnp.int32), axis=1)[:, 0]


# ---------------- demo ----------------
if __name__ == "__main__":
    B = 2
    key = jax.random.PRNGKey(0)
    k_enc, k_dec, k1, k2, k3, k4, k5 = jax.random.split(key, 7)

    enc_params = init_encoder_params(k_enc)
    dec_params = init_decoder_params(k_dec)

    sparse = jax.random.randint(k1, (B, S_SPARSE), 0, NUM_SPARSE_TOKENS, dtype=jnp.int32)
    numeric = jax.random.uniform(k2, (B, S_NUMERIC), dtype=jnp.float32)
    progression = jax.random.randint(k3, (B, S_PROG), 0, NUM_PROG_TOKENS, dtype=jnp.int32)
    candidates = jax.random.randint(k4, (B, S_CAND), 0, NUM_CAND_TOKENS, dtype=jnp.int32)
    index = jax.random.randint(k5, (B,), 0, S_CAND, dtype=jnp.int32)

    x = (sparse, numeric, progression, candidates, index)

    model = Model(enc_params, dec_params, freeze_encoder=True)
    model.mode('training')
    prediction = model(x)
    jax.block_until_ready(prediction)
    assert prediction.shape == (B,)

    # also exercise prediction mode once
    model.mode('prediction')
    scores = model((sparse, numeric, progression, candidates))
    jax.block_until_ready(scores)
    assert scores.shape == (B, S_CAND)

    print("KERNEL_OK")
</pallas_src>

<mosaic_0001>
module attributes {stable_mosaic.version = 11 : i64} {
  func.func @fused_model_kernel(%arg0: memref<32x32xf32, #tpu.memory_space<vmem>>, %arg1: memref<2x32x96xf32, #tpu.memory_space<vmem>>, %arg2: memref<2x1x96xf32, #tpu.memory_space<vmem>>, %arg3: memref<2x32x32xf32, #tpu.memory_space<vmem>>, %arg4: memref<2x32x64xf32, #tpu.memory_space<vmem>>, %arg5: memref<2x1x64xf32, #tpu.memory_space<vmem>>, %arg6: memref<2x64x32xf32, #tpu.memory_space<vmem>>, %arg7: memref<2x6x32xf32, #tpu.memory_space<vmem>>, %arg8: memref<32x32xf32, #tpu.memory_space<vmem>>, %arg9: memref<1x32xf32, #tpu.memory_space<vmem>>, %arg10: memref<32x1xf32, #tpu.memory_space<vmem>>, %arg11: memref<1x1xf32, #tpu.memory_space<vmem>>, %arg12: memref<12x1xf32, #tpu.memory_space<vmem>>) attributes {dimension_semantics = [], scalar_prefetch = 0 : i64, scratch_operands = 0 : i64, tpu.core_type = #tpu.core_type<tc>} {
    %c0 = arith.constant 0 : index
    %c0_0 = arith.constant 0 : index
    %0 = vector.load %arg0[%c0, %c0_0] : memref<32x32xf32, #tpu.memory_space<vmem>>, vector<32x32xf32>
    %c0_1 = arith.constant 0 : index
    %c0_2 = arith.constant 0 : index
    %c0_3 = arith.constant 0 : index
    %1 = vector.load %arg1[%c0_1, %c0_2, %c0_3] : memref<2x32x96xf32, #tpu.memory_space<vmem>>, vector<1x32x96xf32>
    %2 = vector.shape_cast %1 : vector<1x32x96xf32> to vector<32x96xf32>
    %c0_4 = arith.constant 0 : index
    %c0_5 = arith.constant 0 : index
    %c0_6 = arith.constant 0 : index
    %3 = vector.load %arg2[%c0_4, %c0_5, %c0_6] : memref<2x1x96xf32, #tpu.memory_space<vmem>>, vector<1x1x96xf32>
    %4 = vector.shape_cast %3 : vector<1x1x96xf32> to vector<1x96xf32>
    %c0_7 = arith.constant 0 : index
    %c0_8 = arith.constant 0 : index
    %c0_9 = arith.constant 0 : index
    %5 = vector.load %arg3[%c0_7, %c0_8, %c0_9] : memref<2x32x32xf32, #tpu.memory_space<vmem>>, vector<1x32x32xf32>
    %6 = vector.shape_cast %5 : vector<1x32x32xf32> to vector<32x32xf32>
    %c0_10 = arith.constant 0 : index
    %c0_11 = arith.constant 0 : index
    %c0_12 = arith.constant 0 : index
    %7 = vector.load %arg4[%c0_10, %c0_11, %c0_12] : memref<2x32x64xf32, #tpu.memory_space<vmem>>, vector<1x32x64xf32>
    %8 = vector.shape_cast %7 : vector<1x32x64xf32> to vector<32x64xf32>
    %c0_13 = arith.constant 0 : index
    %c0_14 = arith.constant 0 : index
    %c0_15 = arith.constant 0 : index
    %9 = vector.load %arg5[%c0_13, %c0_14, %c0_15] : memref<2x1x64xf32, #tpu.memory_space<vmem>>, vector<1x1x64xf32>
    %10 = vector.shape_cast %9 : vector<1x1x64xf32> to vector<1x64xf32>
    %c0_16 = arith.constant 0 : index
    %c0_17 = arith.constant 0 : index
    %c0_18 = arith.constant 0 : index
    %11 = vector.load %arg6[%c0_16, %c0_17, %c0_18] : memref<2x64x32xf32, #tpu.memory_space<vmem>>, vector<1x64x32xf32>
    %12 = vector.shape_cast %11 : vector<1x64x32xf32> to vector<64x32xf32>
    %c0_19 = arith.constant 0 : index
    %c0_20 = arith.constant 0 : index
    %c0_21 = arith.constant 0 : index
    %13 = vector.load %arg7[%c0_19, %c0_20, %c0_21] : memref<2x6x32xf32, #tpu.memory_space<vmem>>, vector<1x6x32xf32>
    %14 = vector.shape_cast %13 : vector<1x6x32xf32> to vector<6x32xf32>
    %15 = vector.extract_strided_slice %14 {offsets = [0, 0], sizes = [1, 32], strides = [1, 1]} : vector<6x32xf32> to vector<1x32xf32>
    %16 = vector.extract_strided_slice %14 {offsets = [1, 0], sizes = [1, 32], strides = [1, 1]} : vector<6x32xf32> to vector<1x32xf32>
    %17 = vector.extract_strided_slice %14 {offsets = [2, 0], sizes = [1, 32], strides = [1, 1]} : vector<6x32xf32> to vector<1x32xf32>
    %18 = vector.extract_strided_slice %14 {offsets = [3, 0], sizes = [1, 32], strides = [1, 1]} : vector<6x32xf32> to vector<1x32xf32>
    %19 = vector.extract_strided_slice %14 {offsets = [4, 0], sizes = [1, 32], strides = [1, 1]} : vector<6x32xf32> to vector<1x32xf32>
    %20 = vector.extract_strided_slice %14 {offsets = [5, 0], sizes = [1, 32], strides = [1, 1]} : vector<6x32xf32> to vector<1x32xf32>
    %cst = arith.constant dense<0.000000e+00> : vector<32x96xf32>
    %21 = tpu.matmul %0, %2, %cst {dimension_numbers = #tpu.dot_dimension_numbers<[1], [0], [0], [1], [0, 0, 1, 1], [], []>} : vector<32x32xf32>, vector<32x96xf32>, vector<32x96xf32> -> vector<32x96xf32>
    %22 = vector.broadcast %4 : vector<1x96xf32> to vector<32x96xf32>
    %23 = arith.addf %21, %22 : vector<32x96xf32>
    %cst_22 = arith.constant 0.000000e+00 : f32
    %24 = vector.broadcast %cst_22 : f32 to vector<32x32xf32>
    %25 = vector.extract_strided_slice %23 {offsets = [0, 0], sizes = [16, 16], strides = [1, 1]} : vector<32x96xf32> to vector<16x16xf32>
    %26 = vector.extract_strided_slice %23 {offsets = [0, 32], sizes = [16, 16], strides = [1, 1]} : vector<32x96xf32> to vector<16x16xf32>
    %27 = vector.extract_strided_slice %23 {offsets = [0, 64], sizes = [16, 16], strides = [1, 1]} : vector<32x96xf32> to vector<16x16xf32>
    %28 = tpu.transpose %26, [1, 0] : vector<16x16xf32> -> vector<16x16xf32>
    %cst_23 = arith.constant dense<0.000000e+00> : vector<16x16xf32>
    %29 = tpu.matmul %25, %28, %cst_23 {dimension_numbers = #tpu.dot_dimension_numbers<[1], [0], [0], [1], [0, 0, 1, 1], [], []>} : vector<16x16xf32>, vector<16x16xf32>, vector<16x16xf32> -> vector<16x16xf32>
    %cst_24 = arith.constant 2.500000e-01 : f32
    %30 = vector.broadcast %cst_24 : f32 to vector<16x16xf32>
    %31 = arith.mulf %29, %30 : vector<16x16xf32>
    %cst_25 = arith.constant dense<0xFF800000> : vector<16xf32>
    %32 = vector.multi_reduction <maximumf>, %31, %cst_25 [1] : vector<16x16xf32> to vector<16xf32>
    %cst_26 = arith.constant 0xFF800000 : f32
    %33 = vector.broadcast %cst_26 : f32 to vector<16xf32>
    %34 = arith.maximumf %33, %32 : vector<16xf32>
    %35 = vector.shape_cast %34 : vector<16xf32> to vector<16x1xf32>
    %36 = vector.broadcast %35 : vector<16x1xf32> to vector<16x16xf32>
    %37 = arith.subf %31, %36 : vector<16x16xf32>
    %38 = math.exp %37 : vector<16x16xf32>
    %cst_27 = arith.constant dense<0.000000e+00> : vector<16xf32>
    %39 = vector.multi_reduction <add>, %38, %cst_27 [1] : vector<16x16xf32> to vector<16xf32>
    %40 = vector.shape_cast %39 : vector<16xf32> to vector<16x1xf32>
    %41 = vector.broadcast %40 : vector<16x1xf32> to vector<16x16xf32>
    %42 = arith.divf %38, %41 : vector<16x16xf32>
    %cst_28 = arith.constant dense<0.000000e+00> : vector<16x16xf32>
    %43 = tpu.matmul %42, %27, %cst_28 {dimension_numbers = #tpu.dot_dimension_numbers<[1], [0], [0], [1], [0, 0, 1, 1], [], []>} : vector<16x16xf32>, vector<16x16xf32>, vector<16x16xf32> -> vector<16x16xf32>
    %44 = vector.extract_strided_slice %23 {offsets = [16, 0], sizes = [16, 16], strides = [1, 1]} : vector<32x96xf32> to vector<16x16xf32>
    %45 = vector.extract_strided_slice %23 {offsets = [16, 32], sizes = [16, 16], strides = [1, 1]} : vector<32x96xf32> to vector<16x16xf32>
    %46 = vector.extract_strided_slice %23 {offsets = [16, 64], sizes = [16, 16], strides = [1, 1]} : vector<32x96xf32> to vector<16x16xf32>
    %47 = tpu.transpose %45, [1, 0] : vector<16x16xf32> -> vector<16x16xf32>
    %cst_29 = arith.constant dense<0.000000e+00> : vector<16x16xf32>
    %48 = tpu.matmul %44, %47, %cst_29 {dimension_numbers = #tpu.dot_dimension_numbers<[1], [0], [0], [1], [0, 0, 1, 1], [], []>} : vector<16x16xf32>, vector<16x16xf32>, vector<16x16xf32> -> vector<16x16xf32>
    %cst_30 = arith.constant 2.500000e-01 : f32
    %49 = vector.broadcast %cst_30 : f32 to vector<16x16xf32>
    %50 = arith.mulf %48, %49 : vector<16x16xf32>
    %cst_31 = arith.constant dense<0xFF800000> : vector<16xf32>
    %51 = vector.multi_reduction <maximumf>, %50, %cst_31 [1] : vector<16x16xf32> to vector<16xf32>
    %cst_32 = arith.constant 0xFF800000 : f32
    %52 = vector.broadcast %cst_32 : f32 to vector<16xf32>
    %53 = arith.maximumf %52, %51 : vector<16xf32>
    %54 = vector.shape_cast %53 : vector<16xf32> to vector<16x1xf32>
    %55 = vector.broadcast %54 : vector<16x1xf32> to vector<16x16xf32>
    %56 = arith.subf %50, %55 : vector<16x16xf32>
    %57 = math.exp %56 : vector<16x16xf32>
    %cst_33 = arith.constant dense<0.000000e+00> : vector<16xf32>
    %58 = vector.multi_reduction <add>, %57, %cst_33 [1] : vector<16x16xf32> to vector<16xf32>
    %59 = vector.shape_cast %58 : vector<16xf32> to vector<16x1xf32>
    %60 = vector.broadcast %59 : vector<16x1xf32> to vector<16x16xf32>
    %61 = arith.divf %57, %60 : vector<16x16xf32>
    %cst_34 = arith.constant dense<0.000000e+00> : vector<16x16xf32>
    %62 = tpu.matmul %61, %46, %cst_34 {dimension_numbers = #tpu.dot_dimension_numbers<[1], [0], [0], [1], [0, 0, 1, 1], [], []>} : vector<16x16xf32>, vector<16x16xf32>, vector<16x16xf32> -> vector<16x16xf32>
    %63 = tpu.concatenate %43, %62 in 0 : vector<16x16xf32>, vector<16x16xf32> -> vector<32x16xf32>
    %64 = vector.extract_strided_slice %6 {offsets = [0, 0], sizes = [16, 32], strides = [1, 1]} : vector<32x32xf32> to vector<16x32xf32>
    %cst_35 = arith.constant dense<0.000000e+00> : vector<32x32xf32>
    %65 = tpu.matmul %63, %64, %cst_35 {dimension_numbers = #tpu.dot_dimension_numbers<[1], [0], [0], [1], [0, 0, 1, 1], [], []>} : vector<32x16xf32>, vector<16x32xf32>, vector<32x32xf32> -> vector<32x32xf32>
    %66 = arith.addf %24, %65 : vector<32x32xf32>
    %67 = vector.extract_strided_slice %23 {offsets = [0, 16], sizes = [16, 16], strides = [1, 1]} : vector<32x96xf32> to vector<16x16xf32>
    %68 = vector.extract_strided_slice %23 {offsets = [0, 48], sizes = [16, 16], strides = [1, 1]} : vector<32x96xf32> to vector<16x16xf32>
    %69 = vector.extract_strided_slice %23 {offsets = [0, 80], sizes = [16, 16], strides = [1, 1]} : vector<32x96xf32> to vector<16x16xf32>
    %70 = tpu.transpose %68, [1, 0] : vector<16x16xf32> -> vector<16x16xf32>
    %cst_36 = arith.constant dense<0.000000e+00> : vector<16x16xf32>
    %71 = tpu.matmul %67, %70, %cst_36 {dimension_numbers = #tpu.dot_dimension_numbers<[1], [0], [0], [1], [0, 0, 1, 1], [], []>} : vector<16x16xf32>, vector<16x16xf32>, vector<16x16xf32> -> vector<16x16xf32>
    %cst_37 = arith.constant 2.500000e-01 : f32
    %72 = vector.broadcast %cst_37 : f32 to vector<16x16xf32>
    %73 = arith.mulf %71, %72 : vector<16x16xf32>
    %cst_38 = arith.constant dense<0xFF800000> : vector<16xf32>
    %74 = vector.multi_reduction <maximumf>, %73, %cst_38 [1] : vector<16x16xf32> to vector<16xf32>
    %cst_39 = arith.constant 0xFF800000 : f32
    %75 = vector.broadcast %cst_39 : f32 to vector<16xf32>
    %76 = arith.maximumf %75, %74 : vector<16xf32>
    %77 = vector.shape_cast %76 : vector<16xf32> to vector<16x1xf32>
    %78 = vector.broadcast %77 : vector<16x1xf32> to vector<16x16xf32>
    %79 = arith.subf %73, %78 : vector<16x16xf32>
    %80 = math.exp %79 : vector<16x16xf32>
    %cst_40 = arith.constant dense<0.000000e+00> : vector<16xf32>
    %81 = vector.multi_reduction <add>, %80, %cst_40 [1] : vector<16x16xf32> to vector<16xf32>
    %82 = vector.shape_cast %81 : vector<16xf32> to vector<16x1xf32>
    %83 = vector.broadcast %82 : vector<16x1xf32> to vector<16x16xf32>
    %84 = arith.divf %80, %83 : vector<16x16xf32>
    %cst_41 = arith.constant dense<0.000000e+00> : vector<16x16xf32>
    %85 = tpu.matmul %84, %69, %cst_41 {dimension_numbers = #tpu.dot_dimension_numbers<[1], [0], [0], [1], [0, 0, 1, 1], [], []>} : vector<16x16xf32>, vector<16x16xf32>, vector<16x16xf32> -> vector<16x16xf32>
    %86 = vector.extract_strided_slice %23 {offsets = [16, 16], sizes = [16, 16], strides = [1, 1]} : vector<32x96xf32> to vector<16x16xf32>
    %87 = vector.extract_strided_slice %23 {offsets = [16, 48], sizes = [16, 16], strides = [1, 1]} : vector<32x96xf32> to vector<16x16xf32>
    %88 = vector.extract_strided_slice %23 {offsets = [16, 80], sizes = [16, 16], strides = [1, 1]} : vector<32x96xf32> to vector<16x16xf32>
    %89 = tpu.transpose %87, [1, 0] : vector<16x16xf32> -> vector<16x16xf32>
    %cst_42 = arith.constant dense<0.000000e+00> : vector<16x16xf32>
    %90 = tpu.matmul %86, %89, %cst_42 {dimension_numbers = #tpu.dot_dimension_numbers<[1], [0], [0], [1], [0, 0, 1, 1], [], []>} : vector<16x16xf32>, vector<16x16xf32>, vector<16x16xf32> -> vector<16x16xf32>
    %cst_43 = arith.constant 2.500000e-01 : f32
    %91 = vector.broadcast %cst_43 : f32 to vector<16x16xf32>
    %92 = arith.mulf %90, %91 : vector<16x16xf32>
    %cst_44 = arith.constant dense<0xFF800000> : vector<16xf32>
    %93 = vector.multi_reduction <maximumf>, %92, %cst_44 [1] : vector<16x16xf32> to vector<16xf32>
    %cst_45 = arith.constant 0xFF800000 : f32
    %94 = vector.broadcast %cst_45 : f32 to vector<16xf32>
    %95 = arith.maximumf %94, %93 : vector<16xf32>
    %96 = vector.shape_cast %95 : vector<16xf32> to vector<16x1xf32>
    %97 = vector.broadcast %96 : vector<16x1xf32> to vector<16x16xf32>
    %98 = arith.subf %92, %97 : vector<16x16xf32>
    %99 = math.exp %98 : vector<16x16xf32>
    %cst_46 = arith.constant dense<0.000000e+00> : vector<16xf32>
    %100 = vector.multi_reduction <add>, %99, %cst_46 [1] : vector<16x16xf32> to vector<16xf32>
    %101 = vector.shape_cast %100 : vector<16xf32> to vector<16x1xf32>
    %102 = vector.broadcast %101 : vector<16x1xf32> to vector<16x16xf32>
    %103 = arith.divf %99, %102 : vector<16x16xf32>
    %cst_47 = arith.constant dense<0.000000e+00> : vector<16x16xf32>
    %104 = tpu.matmul %103, %88, %cst_47 {dimension_numbers = #tpu.dot_dimension_numbers<[1], [0], [0], [1], [0, 0, 1, 1], [], []>} : vector<16x16xf32>, vector<16x16xf32>, vector<16x16xf32> -> vector<16x16xf32>
    %105 = tpu.concatenate %85, %104 in 0 : vector<16x16xf32>, vector<16x16xf32> -> vector<32x16xf32>
    %106 = vector.extract_strided_slice %6 {offsets = [16, 0], sizes = [16, 32], strides = [1, 1]} : vector<32x32xf32> to vector<16x32xf32>
    %cst_48 = arith.constant dense<0.000000e+00> : vector<32x32xf32>
    %107 = tpu.matmul %105, %106, %cst_48 {dimension_numbers = #tpu.dot_dimension_numbers<[1], [0], [0], [1], [0, 0, 1, 1], [], []>} : vector<32x16xf32>, vector<16x32xf32>, vector<32x32xf32> -> vector<32x32xf32>
    %108 = arith.addf %66, %107 : vector<32x32xf32>
    %109 = vector.broadcast %15 : vector<1x32xf32> to vector<32x32xf32>
    %110 = arith.addf %108, %109 : vector<32x32xf32>
    %111 = arith.addf %0, %110 : vector<32x32xf32>
    %cst_49 = arith.constant dense<0.000000e+00> : vector<32xf32>
    %112 = vector.multi_reduction <add>, %111, %cst_49 [1] : vector<32x32xf32> to vector<32xf32>
    %113 = vector.shape_cast %112 : vector<32xf32> to vector<32x1xf32>
    %cst_50 = arith.constant 3.200000e+01 : f32
    %114 = vector.broadcast %cst_50 : f32 to vector<32x1xf32>
    %115 = arith.divf %113, %114 : vector<32x1xf32>
    %116 = vector.broadcast %115 : vector<32x1xf32> to vector<32x32xf32>
    %117 = arith.subf %111, %116 : vector<32x32xf32>
    %118 = arith.mulf %117, %117 : vector<32x32xf32>
    %cst_51 = arith.constant dense<0.000000e+00> : vector<32xf32>
    %119 = vector.multi_reduction <add>, %118, %cst_51 [1] : vector<32x32xf32> to vector<32xf32>
    %120 = vector.shape_cast %119 : vector<32xf32> to vector<32x1xf32>
    %cst_52 = arith.constant 3.200000e+01 : f32
    %121 = vector.broadcast %cst_52 : f32 to vector<32x1xf32>
    %122 = arith.divf %120, %121 : vector<32x1xf32>
    %123 = vector.broadcast %115 : vector<32x1xf32> to vector<32x32xf32>
    %124 = arith.subf %111, %123 : vector<32x32xf32>
    %cst_53 = arith.constant 9.99999974E-6 : f32
    %125 = vector.broadcast %cst_53 : f32 to vector<32x1xf32>
    %126 = arith.addf %122, %125 : vector<32x1xf32>
    %127 = math.rsqrt %126 : vector<32x1xf32>
    %128 = vector.broadcast %127 : vector<32x1xf32> to vector<32x32xf32>
    %129 = arith.mulf %124, %128 : vector<32x32xf32>
    %130 = vector.broadcast %17 : vector<1x32xf32> to vector<32x32xf32>
    %131 = arith.mulf %129, %130 : vector<32x32xf32>
    %132 = vector.broadcast %18 : vector<1x32xf32> to vector<32x32xf32>
    %133 = arith.addf %131, %132 : vector<32x32xf32>
    %cst_54 = arith.constant dense<0.000000e+00> : vector<32x64xf32>
    %134 = tpu.matmul %133, %8, %cst_54 {dimension_numbers = #tpu.dot_dimension_numbers<[1], [0], [0], [1], [0, 0, 1, 1], [], []>} : vector<32x32xf32>, vector<32x64xf32>, vector<32x64xf32> -> vector<32x64xf32>
    %135 = vector.broadcast %10 : vector<1x64xf32> to vector<32x64xf32>
    %136 = arith.addf %134, %135 : vector<32x64xf32>
    %cst_55 = arith.constant 0.000000e+00 : f32
    %137 = vector.broadcast %cst_55 : f32 to vector<32x64xf32>
    %138 = arith.maximumf %136, %137 : vector<32x64xf32>
    %cst_56 = arith.constant dense<0.000000e+00> : vector<32x32xf32>
    %139 = tpu.matmul %138, %12, %cst_56 {dimension_numbers = #tpu.dot_dimension_numbers<[1], [0], [0], [1], [0, 0, 1, 1], [], []>} : vector<32x64xf32>, vector<64x32xf32>, vector<32x32xf32> -> vector<32x32xf32>
    %140 = vector.broadcast %16 : vector<1x32xf32> to vector<32x32xf32>
    %141 = arith.addf %139, %140 : vector<32x32xf32>
    %142 = arith.addf %133, %141 : vector<32x32xf32>
    %cst_57 = arith.constant dense<0.000000e+00> : vector<32xf32>
    %143 = vector.multi_reduction <add>, %142, %cst_57 [1] : vector<32x32xf32> to vector<32xf32>
    %144 = vector.shape_cast %143 : vector<32xf32> to vector<32x1xf32>
    %cst_58 = arith.constant 3.200000e+01 : f32
    %145 = vector.broadcast %cst_58 : f32 to vector<32x1xf32>
    %146 = arith.divf %144, %145 : vector<32x1xf32>
    %147 = vector.broadcast %146 : vector<32x1xf32> to vector<32x32xf32>
    %148 = arith.subf %142, %147 : vector<32x32xf32>
    %149 = arith.mulf %148, %148 : vector<32x32xf32>
    %cst_59 = arith.constant dense<0.000000e+00> : vector<32xf32>
    %150 = vector.multi_reduction <add>, %149, %cst_59 [1] : vector<32x32xf32> to vector<32xf32>
    %151 = vector.shape_cast %150 : vector<32xf32> to vector<32x1xf32>
    %cst_60 = arith.constant 3.200000e+01 : f32
    %152 = vector.broadcast %cst_60 : f32 to vector<32x1xf32>
    %153 = arith.divf %151, %152 : vector<32x1xf32>
    %154 = vector.broadcast %146 : vector<32x1xf32> to vector<32x32xf32>
    %155 = arith.subf %142, %154 : vector<32x32xf32>
    %cst_61 = arith.constant 9.99999974E-6 : f32
    %156 = vector.broadcast %cst_61 : f32 to vector<32x1xf32>
    %157 = arith.addf %153, %156 : vector<32x1xf32>
    %158 = math.rsqrt %157 : vector<32x1xf32>
    %159 = vector.broadcast %158 : vector<32x1xf32> to vector<32x32xf32>
    %160 = arith.mulf %155, %159 : vector<32x32xf32>
    %161 = vector.broadcast %19 : vector<1x32xf32> to vector<32x32xf32>
    %162 = arith.mulf %160, %161 : vector<32x32xf32>
    %163 = vector.broadcast %20 : vector<1x32xf32> to vector<32x32xf32>
    %164 = arith.addf %162, %163 : vector<32x32xf32>
    %c1 = arith.constant 1 : index
    %c0_62 = arith.constant 0 : index
    %c0_63 = arith.constant 0 : index
    %165 = vector.load %arg1[%c1, %c0_62, %c0_63] : memref<2x32x96xf32, #tpu.memory_space<vmem>>, vector<1x32x96xf32>
    %166 = vector.shape_cast %165 : vector<1x32x96xf32> to vector<32x96xf32>
    %c1_64 = arith.constant 1 : index
    %c0_65 = arith.constant 0 : index
    %c0_66 = arith.constant 0 : index
    %167 = vector.load %arg2[%c1_64, %c0_65, %c0_66] : memref<2x1x96xf32, #tpu.memory_space<vmem>>, vector<1x1x96xf32>
    %168 = vector.shape_cast %167 : vector<1x1x96xf32> to vector<1x96xf32>
    %c1_67 = arith.constant 1 : index
    %c0_68 = arith.constant 0 : index
    %c0_69 = arith.constant 0 : index
    %169 = vector.load %arg3[%c1_67, %c0_68, %c0_69] : memref<2x32x32xf32, #tpu.memory_space<vmem>>, vector<1x32x32xf32>
    %170 = vector.shape_cast %169 : vector<1x32x32xf32> to vector<32x32xf32>
    %c1_70 = arith.constant 1 : index
    %c0_71 = arith.constant 0 : index
    %c0_72 = arith.constant 0 : index
    %171 = vector.load %arg4[%c1_70, %c0_71, %c0_72] : memref<2x32x64xf32, #tpu.memory_space<vmem>>, vector<1x32x64xf32>
    %172 = vector.shape_cast %171 : vector<1x32x64xf32> to vector<32x64xf32>
    %c1_73 = arith.constant 1 : index
    %c0_74 = arith.constant 0 : index
    %c0_75 = arith.constant 0 : index
    %173 = vector.load %arg5[%c1_73, %c0_74, %c0_75] : memref<2x1x64xf32, #tpu.memory_space<vmem>>, vector<1x1x64xf32>
    %174 = vector.shape_cast %173 : vector<1x1x64xf32> to vector<1x64xf32>
    %c1_76 = arith.constant 1 : index
    %c0_77 = arith.constant 0 : index
    %c0_78 = arith.constant 0 : index
    %175 = vector.load %arg6[%c1_76, %c0_77, %c0_78] : memref<2x64x32xf32, #tpu.memory_space<vmem>>, vector<1x64x32xf32>
    %176 = vector.shape_cast %175 : vector<1x64x32xf32> to vector<64x32xf32>
    %c1_79 = arith.constant 1 : index
    %c0_80 = arith.constant 0 : index
    %c0_81 = arith.constant 0 : index
    %177 = vector.load %arg7[%c1_79, %c0_80, %c0_81] : memref<2x6x32xf32, #tpu.memory_space<vmem>>, vector<1x6x32xf32>
    %178 = vector.shape_cast %177 : vector<1x6x32xf32> to vector<6x32xf32>
    %179 = vector.extract_strided_slice %178 {offsets = [0, 0], sizes = [1, 32], strides = [1, 1]} : vector<6x32xf32> to vector<1x32xf32>
    %180 = vector.extract_strided_slice %178 {offsets = [1, 0], sizes = [1, 32], strides = [1, 1]} : vector<6x32xf32> to vector<1x32xf32>
    %181 = vector.extract_strided_slice %178 {offsets = [2, 0], sizes = [1, 32], strides = [1, 1]} : vector<6x32xf32> to vector<1x32xf32>
    %182 = vector.extract_strided_slice %178 {offsets = [3, 0], sizes = [1, 32], strides = [1, 1]} : vector<6x32xf32> to vector<1x32xf32>
    %183 = vector.extract_strided_slice %178 {offsets = [4, 0], sizes = [1, 32], strides = [1, 1]} : vector<6x32xf32> to vector<1x32xf32>
    %184 = vector.extract_strided_slice %178 {offsets = [5, 0], sizes = [1, 32], strides = [1, 1]} : vector<6x32xf32> to vector<1x32xf32>
    %cst_82 = arith.constant dense<0.000000e+00> : vector<32x96xf32>
    %185 = tpu.matmul %164, %166, %cst_82 {dimension_numbers = #tpu.dot_dimension_numbers<[1], [0], [0], [1], [0, 0, 1, 1], [], []>} : vector<32x32xf32>, vector<32x96xf32>, vector<32x96xf32> -> vector<32x96xf32>
    %186 = vector.broadcast %168 : vector<1x96xf32> to vector<32x96xf32>
    %187 = arith.addf %185, %186 : vector<32x96xf32>
    %cst_83 = arith.constant 0.000000e+00 : f32
    %188 = vector.broadcast %cst_83 : f32 to vector<32x32xf32>
    %189 = vector.extract_strided_slice %187 {offsets = [0, 0], sizes = [16, 16], strides = [1, 1]} : vector<32x96xf32> to vector<16x16xf32>
    %190 = vector.extract_strided_slice %187 {offsets = [0, 32], sizes = [16, 16], strides = [1, 1]} : vector<32x96xf32> to vector<16x16xf32>
    %191 = vector.extract_strided_slice %187 {offsets = [0, 64], sizes = [16, 16], strides = [1, 1]} : vector<32x96xf32> to vector<16x16xf32>
    %192 = tpu.transpose %190, [1, 0] : vector<16x16xf32> -> vector<16x16xf32>
    %cst_84 = arith.constant dense<0.000000e+00> : vector<16x16xf32>
    %193 = tpu.matmul %189, %192, %cst_84 {dimension_numbers = #tpu.dot_dimension_numbers<[1], [0], [0], [1], [0, 0, 1, 1], [], []>} : vector<16x16xf32>, vector<16x16xf32>, vector<16x16xf32> -> vector<16x16xf32>
    %cst_85 = arith.constant 2.500000e-01 : f32
    %194 = vector.broadcast %cst_85 : f32 to vector<16x16xf32>
    %195 = arith.mulf %193, %194 : vector<16x16xf32>
    %cst_86 = arith.constant dense<0xFF800000> : vector<16xf32>
    %196 = vector.multi_reduction <maximumf>, %195, %cst_86 [1] : vector<16x16xf32> to vector<16xf32>
    %cst_87 = arith.constant 0xFF800000 : f32
    %197 = vector.broadcast %cst_87 : f32 to vector<16xf32>
    %198 = arith.maximumf %197, %196 : vector<16xf32>
    %199 = vector.shape_cast %198 : vector<16xf32> to vector<16x1xf32>
    %200 = vector.broadcast %199 : vector<16x1xf32> to vector<16x16xf32>
    %201 = arith.subf %195, %200 : vector<16x16xf32>
    %202 = math.exp %201 : vector<16x16xf32>
    %cst_88 = arith.constant dense<0.000000e+00> : vector<16xf32>
    %203 = vector.multi_reduction <add>, %202, %cst_88 [1] : vector<16x16xf32> to vector<16xf32>
    %204 = vector.shape_cast %203 : vector<16xf32> to vector<16x1xf32>
    %205 = vector.broadcast %204 : vector<16x1xf32> to vector<16x16xf32>
    %206 = arith.divf %202, %205 : vector<16x16xf32>
    %cst_89 = arith.constant dense<0.000000e+00> : vector<16x16xf32>
    %207 = tpu.matmul %206, %191, %cst_89 {dimension_numbers = #tpu.dot_dimension_numbers<[1], [0], [0], [1], [0, 0, 1, 1], [], []>} : vector<16x16xf32>, vector<16x16xf32>, vector<16x16xf32> -> vector<16x16xf32>
    %208 = vector.extract_strided_slice %187 {offsets = [16, 0], sizes = [16, 16], strides = [1, 1]} : vector<32x96xf32> to vector<16x16xf32>
    %209 = vector.extract_strided_slice %187 {offsets = [16, 32], sizes = [16, 16], strides = [1, 1]} : vector<32x96xf32> to vector<16x16xf32>
    %210 = vector.extract_strided_slice %187 {offsets = [16, 64], sizes = [16, 16], strides = [1, 1]} : vector<32x96xf32> to vector<16x16xf32>
    %211 = tpu.transpose %209, [1, 0] : vector<16x16xf32> -> vector<16x16xf32>
    %cst_90 = arith.constant dense<0.000000e+00> : vector<16x16xf32>
    %212 = tpu.matmul %208, %211, %cst_90 {dimension_numbers = #tpu.dot_dimension_numbers<[1], [0], [0], [1], [0, 0, 1, 1], [], []>} : vector<16x16xf32>, vector<16x16xf32>, vector<16x16xf32> -> vector<16x16xf32>
    %cst_91 = arith.constant 2.500000e-01 : f32
    %213 = vector.broadcast %cst_91 : f32 to vector<16x16xf32>
    %214 = arith.mulf %212, %213 : vector<16x16xf32>
    %cst_92 = arith.constant dense<0xFF800000> : vector<16xf32>
    %215 = vector.multi_reduction <maximumf>, %214, %cst_92 [1] : vector<16x16xf32> to vector<16xf32>
    %cst_93 = arith.constant 0xFF800000 : f32
    %216 = vector.broadcast %cst_93 : f32 to vector<16xf32>
    %217 = arith.maximumf %216, %215 : vector<16xf32>
    %218 = vector.shape_cast %217 : vector<16xf32> to vector<16x1xf32>
    %219 = vector.broadcast %218 : vector<16x1xf32> to vector<16x16xf32>
    %220 = arith.subf %214, %219 : vector<16x16xf32>
    %221 = math.exp %220 : vector<16x16xf32>
    %cst_94 = arith.constant dense<0.000000e+00> : vector<16xf32>
    %222 = vector.multi_reduction <add>, %221, %cst_94 [1] : vector<16x16xf32> to vector<16xf32>
    %223 = vector.shape_cast %222 : vector<16xf32> to vector<16x1xf32>
    %224 = vector.broadcast %223 : vector<16x1xf32> to vector<16x16xf32>
    %225 = arith.divf %221, %224 : vector<16x16xf32>
    %cst_95 = arith.constant dense<0.000000e+00> : vector<16x16xf32>
    %226 = tpu.matmul %225, %210, %cst_95 {dimension_numbers = #tpu.dot_dimension_numbers<[1], [0], [0], [1], [0, 0, 1, 1], [], []>} : vector<16x16xf32>, vector<16x16xf32>, vector<16x16xf32> -> vector<16x16xf32>
    %227 = tpu.concatenate %207, %226 in 0 : vector<16x16xf32>, vector<16x16xf32> -> vector<32x16xf32>
    %228 = vector.extract_strided_slice %170 {offsets = [0, 0], sizes = [16, 32], strides = [1, 1]} : vector<32x32xf32> to vector<16x32xf32>
    %cst_96 = arith.constant dense<0.000000e+00> : vector<32x32xf32>
    %229 = tpu.matmul %227, %228, %cst_96 {dimension_numbers = #tpu.dot_dimension_numbers<[1], [0], [0], [1], [0, 0, 1, 1], [], []>} : vector<32x16xf32>, vector<16x32xf32>, vector<32x32xf32> -> vector<32x32xf32>
    %230 = arith.addf %188, %229 : vector<32x32xf32>
    %231 = vector.extract_strided_slice %187 {offsets = [0, 16], sizes = [16, 16], strides = [1, 1]} : vector<32x96xf32> to vector<16x16xf32>
    %232 = vector.extract_strided_slice %187 {offsets = [0, 48], sizes = [16, 16], strides = [1, 1]} : vector<32x96xf32> to vector<16x16xf32>
    %233 = vector.extract_strided_slice %187 {offsets = [0, 80], sizes = [16, 16], strides = [1, 1]} : vector<32x96xf32> to vector<16x16xf32>
    %234 = tpu.transpose %232, [1, 0] : vector<16x16xf32> -> vector<16x16xf32>
    %cst_97 = arith.constant dense<0.000000e+00> : vector<16x16xf32>
    %235 = tpu.matmul %231, %234, %cst_97 {dimension_numbers = #tpu.dot_dimension_numbers<[1], [0], [0], [1], [0, 0, 1, 1], [], []>} : vector<16x16xf32>, vector<16x16xf32>, vector<16x16xf32> -> vector<16x16xf32>
    %cst_98 = arith.constant 2.500000e-01 : f32
    %236 = vector.broadcast %cst_98 : f32 to vector<16x16xf32>
    %237 = arith.mulf %235, %236 : vector<16x16xf32>
    %cst_99 = arith.constant dense<0xFF800000> : vector<16xf32>
    %238 = vector.multi_reduction <maximumf>, %237, %cst_99 [1] : vector<16x16xf32> to vector<16xf32>
    %cst_100 = arith.constant 0xFF800000 : f32
    %239 = vector.broadcast %cst_100 : f32 to vector<16xf32>
    %240 = arith.maximumf %239, %238 : vector<16xf32>
    %241 = vector.shape_cast %240 : vector<16xf32> to vector<16x1xf32>
    %242 = vector.broadcast %241 : vector<16x1xf32> to vector<16x16xf32>
    %243 = arith.subf %237, %242 : vector<16x16xf32>
    %244 = math.exp %243 : vector<16x16xf32>
    %cst_101 = arith.constant dense<0.000000e+00> : vector<16xf32>
    %245 = vector.multi_reduction <add>, %244, %cst_101 [1] : vector<16x16xf32> to vector<16xf32>
    %246 = vector.shape_cast %245 : vector<16xf32> to vector<16x1xf32>
    %247 = vector.broadcast %246 : vector<16x1xf32> to vector<16x16xf32>
    %248 = arith.divf %244, %247 : vector<16x16xf32>
    %cst_102 = arith.constant dense<0.000000e+00> : vector<16x16xf32>
    %249 = tpu.matmul %248, %233, %cst_102 {dimension_numbers = #tpu.dot_dimension_numbers<[1], [0], [0], [1], [0, 0, 1, 1], [], []>} : vector<16x16xf32>, vector<16x16xf32>, vector<16x16xf32> -> vector<16x16xf32>
    %250 = vector.extract_strided_slice %187 {offsets = [16, 16], sizes = [16, 16], strides = [1, 1]} : vector<32x96xf32> to vector<16x16xf32>
    %251 = vector.extract_strided_slice %187 {offsets = [16, 48], sizes = [16, 16], strides = [1, 1]} : vector<32x96xf32> to vector<16x16xf32>
    %252 = vector.extract_strided_slice %187 {offsets = [16, 80], sizes = [16, 16], strides = [1, 1]} : vector<32x96xf32> to vector<16x16xf32>
    %253 = tpu.transpose %251, [1, 0] : vector<16x16xf32> -> vector<16x16xf32>
    %cst_103 = arith.constant dense<0.000000e+00> : vector<16x16xf32>
    %254 = tpu.matmul %250, %253, %cst_103 {dimension_numbers = #tpu.dot_dimension_numbers<[1], [0], [0], [1], [0, 0, 1, 1], [], []>} : vector<16x16xf32>, vector<16x16xf32>, vector<16x16xf32> -> vector<16x16xf32>
    %cst_104 = arith.constant 2.500000e-01 : f32
    %255 = vector.broadcast %cst_104 : f32 to vector<16x16xf32>
    %256 = arith.mulf %254, %255 : vector<16x16xf32>
    %cst_105 = arith.constant dense<0xFF800000> : vector<16xf32>
    %257 = vector.multi_reduction <maximumf>, %256, %cst_105 [1] : vector<16x16xf32> to vector<16xf32>
    %cst_106 = arith.constant 0xFF800000 : f32
    %258 = vector.broadcast %cst_106 : f32 to vector<16xf32>
    %259 = arith.maximumf %258, %257 : vector<16xf32>
    %260 = vector.shape_cast %259 : vector<16xf32> to vector<16x1xf32>
    %261 = vector.broadcast %260 : vector<16x1xf32> to vector<16x16xf32>
    %262 = arith.subf %256, %261 : vector<16x16xf32>
    %263 = math.exp %262 : vector<16x16xf32>
    %cst_107 = arith.constant dense<0.000000e+00> : vector<16xf32>
    %264 = vector.multi_reduction <add>, %263, %cst_107 [1] : vector<16x16xf32> to vector<16xf32>
    %265 = vector.shape_cast %264 : vector<16xf32> to vector<16x1xf32>
    %266 = vector.broadcast %265 : vector<16x1xf32> to vector<16x16xf32>
    %267 = arith.divf %263, %266 : vector<16x16xf32>
    %cst_108 = arith.constant dense<0.000000e+00> : vector<16x16xf32>
    %268 = tpu.matmul %267, %252, %cst_108 {dimension_numbers = #tpu.dot_dimension_numbers<[1], [0], [0], [1], [0, 0, 1, 1], [], []>} : vector<16x16xf32>, vector<16x16xf32>, vector<16x16xf32> -> vector<16x16xf32>
    %269 = tpu.concatenate %249, %268 in 0 : vector<16x16xf32>, vector<16x16xf32> -> vector<32x16xf32>
    %270 = vector.extract_strided_slice %170 {offsets = [16, 0], sizes = [16, 32], strides = [1, 1]} : vector<32x32xf32> to vector<16x32xf32>
    %cst_109 = arith.constant dense<0.000000e+00> : vector<32x32xf32>
    %271 = tpu.matmul %269, %270, %cst_109 {dimension_numbers = #tpu.dot_dimension_numbers<[1], [0], [0], [1], [0, 0, 1, 1], [], []>} : vector<32x16xf32>, vector<16x32xf32>, vector<32x32xf32> -> vector<32x32xf32>
    %272 = arith.addf %230, %271 : vector<32x32xf32>
    %273 = vector.broadcast %179 : vector<1x32xf32> to vector<32x32xf32>
    %274 = arith.addf %272, %273 : vector<32x32xf32>
    %275 = arith.addf %164, %274 : vector<32x32xf32>
    %cst_110 = arith.constant dense<0.000000e+00> : vector<32xf32>
    %276 = vector.multi_reduction <add>, %275, %cst_110 [1] : vector<32x32xf32> to vector<32xf32>
    %277 = vector.shape_cast %276 : vector<32xf32> to vector<32x1xf32>
    %cst_111 = arith.constant 3.200000e+01 : f32
    %278 = vector.broadcast %cst_111 : f32 to vector<32x1xf32>
    %279 = arith.divf %277, %278 : vector<32x1xf32>
    %280 = vector.broadcast %279 : vector<32x1xf32> to vector<32x32xf32>
    %281 = arith.subf %275, %280 : vector<32x32xf32>
    %282 = arith.mulf %281, %281 : vector<32x32xf32>
    %cst_112 = arith.constant dense<0.000000e+00> : vector<32xf32>
    %283 = vector.multi_reduction <add>, %282, %cst_112 [1] : vector<32x32xf32> to vector<32xf32>
    %284 = vector.shape_cast %283 : vector<32xf32> to vector<32x1xf32>
    %cst_113 = arith.constant 3.200000e+01 : f32
    %285 = vector.broadcast %cst_113 : f32 to vector<32x1xf32>
    %286 = arith.divf %284, %285 : vector<32x1xf32>
    %287 = vector.broadcast %279 : vector<32x1xf32> to vector<32x32xf32>
    %288 = arith.subf %275, %287 : vector<32x32xf32>
    %cst_114 = arith.constant 9.99999974E-6 : f32
    %289 = vector.broadcast %cst_114 : f32 to vector<32x1xf32>
    %290 = arith.addf %286, %289 : vector<32x1xf32>
    %291 = math.rsqrt %290 : vector<32x1xf32>
    %292 = vector.broadcast %291 : vector<32x1xf32> to vector<32x32xf32>
    %293 = arith.mulf %288, %292 : vector<32x32xf32>
    %294 = vector.broadcast %181 : vector<1x32xf32> to vector<32x32xf32>
    %295 = arith.mulf %293, %294 : vector<32x32xf32>
    %296 = vector.broadcast %182 : vector<1x32xf32> to vector<32x32xf32>
    %297 = arith.addf %295, %296 : vector<32x32xf32>
    %cst_115 = arith.constant dense<0.000000e+00> : vector<32x64xf32>
    %298 = tpu.matmul %297, %172, %cst_115 {dimension_numbers = #tpu.dot_dimension_numbers<[1], [0], [0], [1], [0, 0, 1, 1], [], []>} : vector<32x32xf32>, vector<32x64xf32>, vector<32x64xf32> -> vector<32x64xf32>
    %299 = vector.broadcast %174 : vector<1x64xf32> to vector<32x64xf32>
    %300 = arith.addf %298, %299 : vector<32x64xf32>
    %cst_116 = arith.constant 0.000000e+00 : f32
    %301 = vector.broadcast %cst_116 : f32 to vector<32x64xf32>
    %302 = arith.maximumf %300, %301 : vector<32x64xf32>
    %cst_117 = arith.constant dense<0.000000e+00> : vector<32x32xf32>
    %303 = tpu.matmul %302, %176, %cst_117 {dimension_numbers = #tpu.dot_dimension_numbers<[1], [0], [0], [1], [0, 0, 1, 1], [], []>} : vector<32x64xf32>, vector<64x32xf32>, vector<32x32xf32> -> vector<32x32xf32>
    %304 = vector.broadcast %180 : vector<1x32xf32> to vector<32x32xf32>
    %305 = arith.addf %303, %304 : vector<32x32xf32>
    %306 = arith.addf %297, %305 : vector<32x32xf32>
    %cst_118 = arith.constant dense<0.000000e+00> : vector<32xf32>
    %307 = vector.multi_reduction <add>, %306, %cst_118 [1] : vector<32x32xf32> to vector<32xf32>
    %308 = vector.shape_cast %307 : vector<32xf32> to vector<32x1xf32>
    %cst_119 = arith.constant 3.200000e+01 : f32
    %309 = vector.broadcast %cst_119 : f32 to vector<32x1xf32>
    %310 = arith.divf %308, %309 : vector<32x1xf32>
    %311 = vector.broadcast %310 : vector<32x1xf32> to vector<32x32xf32>
    %312 = arith.subf %306, %311 : vector<32x32xf32>
    %313 = arith.mulf %312, %312 : vector<32x32xf32>
    %cst_120 = arith.constant dense<0.000000e+00> : vector<32xf32>
    %314 = vector.multi_reduction <add>, %313, %cst_120 [1] : vector<32x32xf32> to vector<32xf32>
    %315 = vector.shape_cast %314 : vector<32xf32> to vector<32x1xf32>
    %cst_121 = arith.constant 3.200000e+01 : f32
    %316 = vector.broadcast %cst_121 : f32 to vector<32x1xf32>
    %317 = arith.divf %315, %316 : vector<32x1xf32>
    %318 = vector.broadcast %310 : vector<32x1xf32> to vector<32x32xf32>
    %319 = arith.subf %306, %318 : vector<32x32xf32>
    %cst_122 = arith.constant 9.99999974E-6 : f32
    %320 = vector.broadcast %cst_122 : f32 to vector<32x1xf32>
    %321 = arith.addf %317, %320 : vector<32x1xf32>
    %322 = math.rsqrt %321 : vector<32x1xf32>
    %323 = vector.broadcast %322 : vector<32x1xf32> to vector<32x32xf32>
    %324 = arith.mulf %319, %323 : vector<32x32xf32>
    %325 = vector.broadcast %183 : vector<1x32xf32> to vector<32x32xf32>
    %326 = arith.mulf %324, %325 : vector<32x32xf32>
    %327 = vector.broadcast %184 : vector<1x32xf32> to vector<32x32xf32>
    %328 = arith.addf %326, %327 : vector<32x32xf32>
    %329 = vector.extract_strided_slice %328 {offsets = [10, 0], sizes = [6, 32], strides = [1, 1]} : vector<32x32xf32> to vector<6x32xf32>
    %330 = vector.extract_strided_slice %328 {offsets = [26, 0], sizes = [6, 32], strides = [1, 1]} : vector<32x32xf32> to vector<6x32xf32>
    %331 = tpu.concatenate %329, %330 in 0 : vector<6x32xf32>, vector<6x32xf32> -> vector<12x32xf32>
    %c0_123 = arith.constant 0 : index
    %c0_124 = arith.constant 0 : index
    %332 = vector.load %arg8[%c0_123, %c0_124] : memref<32x32xf32, #tpu.memory_space<vmem>>, vector<32x32xf32>
    %cst_125 = arith.constant dense<0.000000e+00> : vector<12x32xf32>
    %333 = tpu.matmul %331, %332, %cst_125 {dimension_numbers = #tpu.dot_dimension_numbers<[1], [0], [0], [1], [0, 0, 1, 1], [], []>} : vector<12x32xf32>, vector<32x32xf32>, vector<12x32xf32> -> vector<12x32xf32>
    %c0_126 = arith.constant 0 : index
    %c0_127 = arith.constant 0 : index
    %334 = vector.load %arg9[%c0_126, %c0_127] : memref<1x32xf32, #tpu.memory_space<vmem>>, vector<1x32xf32>
    %335 = vector.broadcast %334 : vector<1x32xf32> to vector<12x32xf32>
    %336 = arith.addf %333, %335 : vector<12x32xf32>
    %cst_128 = arith.constant 0.000000e+00 : f32
    %337 = vector.broadcast %cst_128 : f32 to vector<12x32xf32>
    %338 = arith.maximumf %336, %337 : vector<12x32xf32>
    %c0_129 = arith.constant 0 : index
    %c0_130 = arith.constant 0 : index
    %339 = vector.load %arg10[%c0_129, %c0_130] : memref<32x1xf32, #tpu.memory_space<vmem>>, vector<32x1xf32>
    %cst_131 = arith.constant dense<0.000000e+00> : vector<12x1xf32>
    %340 = tpu.matmul %338, %339, %cst_131 {dimension_numbers = #tpu.dot_dimension_numbers<[1], [0], [0], [1], [0, 0, 1, 1], [], []>} : vector<12x32xf32>, vector<32x1xf32>, vector<12x1xf32> -> vector<12x1xf32>
    %c0_132 = arith.constant 0 : index
    %c0_133 = arith.constant 0 : index
    %341 = vector.load %arg11[%c0_132, %c0_133] : memref<1x1xf32, #tpu.memory_space<vmem>>, vector<1x1xf32>
    %342 = vector.broadcast %341 : vector<1x1xf32> to vector<12x1xf32>
    %343 = arith.addf %340, %342 : vector<12x1xf32>
    %c0_134 = arith.constant 0 : index
    %c0_135 = arith.constant 0 : index
    %344 = vector.load %arg12[%c0_134, %c0_135] : memref<12x1xf32, #tpu.memory_space<vmem>>, vector<12x1xf32>
    tpu.vector_store %arg12[%c0_134, %c0_135], %343 {strides = array<i32>} : memref<12x1xf32, #tpu.memory_space<vmem>>, vector<12x1xf32>,
    return
  }
}

</mosaic_0001>

<bundles_post_ra>
// kernel: tpu_custom_call.1
= control target key start
LH: loop header
LB: loop body
LE: loop exit
PB: predicated region body
PF: predicated region fallthrough
CT: control target
= control target key end

     0   :  { %s4769_s0 = inlined_call_operand.hbm [shape: f32[32,32], index: 0, kind: input, shape index: {}]   ;;  %s4770_s1 = inlined_call_operand.vmem [shape: f32[2,32,96], index: 1, kind: input, shape index: {}]   ;;  %s4771_s2 = inlined_call_operand.vmem [shape: f32[2,1,96], index: 2, kind: input, shape index: {}]   ;;  %s4772_s3 = inlined_call_operand.vmem [shape: f32[2,32,32], index: 3, kind: input, shape index: {}]   ;;  %s4773_s4 = inlined_call_operand.vmem [shape: f32[2,32,64], index: 4, kind: input, shape index: {}]   ;;  %s4774_s5 = inlined_call_operand.vmem [shape: f32[2,1,64], index: 5, kind: input, shape index: {}]   ;;  %s4775_s6 = inlined_call_operand.vmem [shape: f32[2,64,32], index: 6, kind: input, shape index: {}]   ;;  %s4776_s7 = inlined_call_operand.vmem [shape: f32[2,6,32], index: 7, kind: input, shape index: {}]   ;;  %s4777_s8 = inlined_call_operand.hbm [shape: f32[32,32], index: 8, kind: input, shape index: {}]   ;;  %s4778_s9 = inlined_call_operand.vmem [shape: f32[1,32], index: 9, kind: input, shape index: {}]   ;;  %s4779_s10 = inlined_call_operand.vmem [shape: f32[32,1], index: 10, kind: input, shape index: {}]   ;;  %s4780_s11 = inlined_call_operand.<no memory space> [shape: f32[1,1], index: 11, kind: input, shape index: {}]   ;;  %s4781_s12 = inlined_call_operand.vmem [shape: f32[12,1], index: 12, kind: output, shape index: {}]  }
   0x1   :  { %v17_v0 = vstv %s4780_s11 }
   0x2   :  { %18 = vst [vmem:[#allocation2] sm:$0x1] %v17_v0 }
   0x3   :  { %19 = vsyncpa [#allocation4], 0 }
   0x4   :  { %20 = vsyncpa [#allocation6], 0  ;;  %s4187_s23 = smov [#allocation3]   ;;  %s4139_s27 = scalar_lea.hbm %s4769_s0, 512 }
   0x5   :  { %s26_s24 = sshll.u32 %s4187_s23, 4  ;;  %p4140_p0 = scmp.ne.s32.totalorder %s4769_s0, %s4139_s27  ;;  %s27_s24 = int_to_ptr.vmem [resolvable:$true] %s26_s24 }
   0x6   :  { %p4143_p1 = scmp.lt.u32.totalorder %s4139_s27, %s4769_s0 }
   0x8   :  { %p4145_p2 = pnand %p4143_p1, %p4140_p0 }
   0xa   :  { %4148 = shalt.err (!%p4145_p2)
}
   0xb   :  { %s4149_s11 = scalar_lea.vmem %s27_s24, 512  ;;  %p4154_p4 = scmp.lt.s32.totalorder %s27_s24, %s27_s24 }
   0xc   :  { %p4150_p3 = scmp.ne.s32.totalorder %s27_s24, %s4149_s11  ;;  %p4155_p5 = scmp.lt.s32.totalorder %s4149_s11, %s4149_s11 }
   0xe   :  { %p4156_p6 = por %p4155_p5, %p4154_p4 }
  0x10   :  { %p4157_p7 = pnand %p4156_p6, %p4150_p3 }
  0x12   :  { %4160 = shalt.err (!%p4157_p7)
}
  0x13   :  { %s4188_s14 = smov 128   ;;  %s4189_s15 = smov 8  }
  0x14   :  { %32 = dma.hbm_to_vmem [thread:$0]  %s4769_s0, 512, %s27_s24, [#allocation4], %s4188_s14, %s4188_s14, %s4189_s15  }
  0x15   :  { %s4190_s18 = smov [#allocation5]   ;;  %s4161_s22 = scalar_lea.hbm %s4777_s8, 512 }
  0x16   :  { %s52_s19 = sshll.u32 %s4190_s18, 4  ;;  %p4162_p8 = scmp.ne.s32.totalorder %s4777_s8, %s4161_s22  ;;  %s53_s19 = int_to_ptr.vmem [resolvable:$true] %s52_s19 }
  0x17   :  { %p4165_p9 = scmp.lt.u32.totalorder %s4161_s22, %s4777_s8 }
  0x19   :  { %p4167_p10 = pnand %p4165_p9, %p4162_p8 }
  0x1b   :  { %4170 = shalt.err (!%p4167_p10)
}
  0x1c   :  { %s4171_s28 = scalar_lea.vmem %s53_s19, 512  ;;  %p4176_p12 = scmp.lt.s32.totalorder %s53_s19, %s53_s19 }
  0x1d   :  { %p4172_p11 = scmp.ne.s32.totalorder %s53_s19, %s4171_s28  ;;  %p4177_p13 = scmp.lt.s32.totalorder %s4171_s28, %s4171_s28 }
  0x1f   :  { %p4178_p0 = por %p4177_p13, %p4176_p12 }
  0x21   :  { %p4179_p1 = pnand %p4178_p0, %p4172_p11 }
  0x23   :  { %4182 = shalt.err (!%p4179_p1)
}
  0x24   :  { %58 = dma.hbm_to_vmem [thread:$0]  %s4777_s8, 512, %s53_s19, [#allocation6], %s4188_s14, %s4188_s14, %s4189_s15  }
  0x25   :  { %4183 = dma.done.wait [#allocation4], 512  }
  0x26   :  { %4184 = vsyncadd [#allocation4], 4294966784 }
  0x27   :  { %4185 = dma.done.wait [#allocation6], 512  }
  0x28   :  { %4186 = vsyncadd [#allocation6], 4294966784  ;;  %vm104_vm0 = vcmask 261120   ;;  %v75_v1 = vld [vmem:[%s4770_s1] sm:$0xff]  ;;  %v76_v2 = vld [vmem:[%s4770_s1 + $0x8] sm:$0xff]  ;;  %vm208_vm1 = vcmask 130048  }
  0x29   :  { %v77_v3 = vld [vmem:[%s4770_s1 + $0x10] sm:$0xff]  ;;  %v3774_v4 = vpack.c.bf16 %v76_v2, %v75_v1  ;;  %v78_v5 = vld [vmem:[%s4770_s1 + $0x18] sm:$0xff]  ;;  %v4300_v6 = vld [vmem:[#allocation3] sm:$0xff]  ;;  %s4191_s19 = smov 80   ;;  %s4192_s20 = smov 96   ;;  %vm1393_vm3 = vcmask 523264  }
  0x2a   :  { %v3778_v7 = vpack.c.bf16 %v78_v5, %v77_v3  ;;  %3508 = vmatprep.mubr.msk.f32.mxu0 %vm104_vm0, %v4300_v6  ;;  %v4304_v8 = vld [vmem:[#allocation3 + $0x8] sm:$0xff]  ;;  %v4306_v9 = vld [vmem:[#allocation3 + $0x10] sm:$0xff]  ;;  %v4312_v10 = vld [vmem:[#allocation3 + $0x18] sm:$0xff]  ;;  %s4193_s21 = smov 112   ;;  %s4194_s22 = smov 64   ;;  %vm3026_vm4 = vcmask 1045504  }
  0x2b   :  { %3775 = vmatprep.subr.bf16.mxu0 %v3774_v4  ;;  %v3223_v11 = vld [vmem:[%s4771_s2] ss:$0 sm:$0xff]  ;;  %vm4342_vm2 = vmpackc.low %vm208_vm1, %vm208_vm1  ;;  %s4195_s23 = smov 48   ;;  %vm3215_vm5 = vcmask 3072   ;;  %vm3213_vm6 = vcmask 7168  }
  0x2c   :  { %3777 = vmatpush3.bf16.msra.mxu0 %v3774_v4 }
  0x2d   :  { %3779 = vmatprep.subr.bf16.mxu0 %v3778_v7 }
  0x30   :  { %3781 = vmatpush3.bf16.msra.mxu0 %v3778_v7 }
  0x33   :  { %3509 = vmatmul.mubr.msk.f32.vlgmr.msra.gmra.mrb[0].mxu0 %vm104_vm0, %v4304_v8 }
  0x34   :  { %3511 = vmatprep.mubr.msk.f32.mxu0 %vm104_vm0, %v4306_v9 }
  0x37   :  { %3512 = vmatmul.mubr.msk.f32.gmra.mrb[2].mxu0 %vm104_vm0, %v4312_v10 }
 0x106   :  { %v3510_v12 = vpop.f32.mrb[0].mxu0 }
 0x107   :  { %v189_v13 = vadd.f32 %v3510_v12, %v3223_v11  ;;  %v183_v14 = vpop.f32.mrb[1].mxu0 }
 0x108   :  { %v184_v15 = vadd.f32 %v3223_v11, %v183_v14 }
 0x10a   :  { %v3513_v16 = vpop.f32.mrb[2].mxu0  ;;  %3518 = vmatprep.mubr.msk.f32.mxu1 %vm208_vm1, %v184_v15  ;;  %v4320_v17 = vpack.i.bf16 %v189_v13, %v184_v15 }
 0x10b   :  { %v4322_v18 = vadd.f32 %v3513_v16, %v3223_v11  ;;  %v193_v19 = vpop.f32.mrb[3].mxu0 }
 0x10c   :  { %v4324_v20 = vadd.f32 %v3223_v11, %v193_v19  ;;  %3978 = vrot.lane.b32.xlu1 %v4320_v17, %s4191_s19  ;;  %3968 = vrot.lane.b32.xlu0 %v4320_v17, %s4192_s20 }
 0x10e   :  { %3532 = vmatprep.mubr.msk.f32.mxu0 %vm208_vm1, %v4324_v20  ;;  %v4334_v21 = vpack.i.bf16 %v4322_v18, %v4324_v20 }
 0x110   :  { %603 = vrot.lane.b32.xlu1 %v184_v15, %s4193_s21  ;;  %3973 = vrot.lane.b32.xlu0 %v4334_v21, %s4192_s20 }
 0x114   :  { %605 = vrot.lane.b32.xlu0 %v189_v13, %s4193_s21 }
 0x17e   :  { %v3969_v22 = vpop.permute.xlu0 %3968  ;;  %v3979_v25 = vpop.permute.xlu1 %3978 }
 0x17f   :  { %v3971_v23 = vunpack.i.h.bf16 %v3969_v22  ;;  %v3970_v24 = vunpack.i.l.bf16 %v3969_v22  ;;  %v3981_v29 = vunpack.i.h.bf16 %v3979_v25  ;;  %v3980_v30 = vunpack.i.l.bf16 %v3979_v25 }
 0x181   :  { %v3782_v27 = vpack.c.bf16 %v3971_v23, %v3970_v24  ;;  %v3802_v34 = vpack.c.bf16 %v3981_v29, %v3980_v30 }
 0x182   :  { %v3974_v28 = vpop.permute.xlu0 %3973  ;;  %v604_v35 = vpop.permute.xlu1 %603 }
 0x183   :  { %v3976_v31 = vunpack.i.h.bf16 %v3974_v28  ;;  %v3975_v32 = vunpack.i.l.bf16 %v3974_v28  ;;  %3784 = vmatprep.subr.msk.bf16.mxu1 %vm4342_vm2, %v3782_v27 }
 0x184   :  { %3787 = vmatpush3.bf16.xpose.msk.msra.mxu1 %vm4342_vm2, %v3782_v27 }
 0x185   :  { %v3792_v33 = vpack.c.bf16 %v3976_v31, %v3975_v32 }
 0x186   :  { %v606_v36 = vpop.permute.xlu0 %605 }
 0x187   :  { %3794 = vmatprep.subr.msk.bf16.mxu0 %vm4342_vm2, %v3792_v33 }
 0x188   :  { %3797 = vmatpush3.bf16.xpose.msk.msra.mxu0 %vm4342_vm2, %v3792_v33 }
 0x189   :  { %3804 = vmatprep.subr.msk.bf16.mxu0 %vm4342_vm2, %v3802_v34 }
 0x18b   :  { %3519 = vmatmul.mubr.msk.f32.vlgmr.msra.gmra.mrb[0].mxu1 %vm208_vm1, %v189_v13 }
 0x18f   :  { %3533 = vmatmul.mubr.msk.f32.vlgmr.msra.gmra.mrb[4].mxu0 %vm208_vm1, %v4322_v18 }
 0x190   :  { %3807 = vmatpush3.bf16.xpose.msk.msra.mxu0 %vm4342_vm2, %v3802_v34  ;;  %3546 = vmatprep.mubr.msk.f32.mxu0 %vm208_vm1, %v604_v35 }
 0x197   :  { %3547 = vmatmul.mubr.msk.f32.vlgmr.msra.gmra.mrb[6].mxu0 %vm208_vm1, %v606_v36 }
 0x25e   :  { %v3520_v37 = vpop.f32.mrb[0].mxu1 }
 0x25f   :  { %v293_v38 = vmul.f32 0.25, %v3520_v37  ;;  %v283_v39 = vpop.f32.mrb[1].mxu1 }
 0x260   :  { %v292_v40 = vmul.f32 0.25, %v283_v39 }
 0x261   :  { %v297_v41 = vsel %vm208_vm1, %v293_v38, -inf }
 0x262   :  { %v3534_v42 = vpop.f32.mrb[4].mxu0  ;;  %298 = vmax.xlane.f32.xlu0 %v297_v41  ;;  %v294_v43 = vsel %vm208_vm1, %v292_v40, -inf }
 0x263   :  { %v493_v44 = vmul.f32 0.25, %v3534_v42  ;;  %v483_v45 = vpop.f32.mrb[5].mxu0  ;;  %295 = vmax.xlane.f32.xlu1 %v294_v43 }
 0x264   :  { %v492_v46 = vmul.f32 0.25, %v483_v45 }
 0x265   :  { %v497_v47 = vsel %vm208_vm1, %v493_v44, -inf }
 0x266   :  { %v494_v48 = vsel %vm208_vm1, %v492_v46, -inf }
 0x267   :  { %495 = vmax.xlane.f32.xlu0 %v494_v48  ;;  %498 = vmax.xlane.f32.xlu1 %v497_v47 }
 0x26a   :  { %v3548_v49 = vpop.f32.mrb[6].mxu0 }
 0x26b   :  { %v695_v50 = vmul.f32 0.25, %v3548_v49  ;;  %v685_v51 = vpop.f32.mrb[7].mxu0 }
 0x26c   :  { %v694_v52 = vmul.f32 0.25, %v685_v51 }
 0x26d   :  { %v699_v53 = vsel %vm208_vm1, %v695_v50, -inf }
 0x26e   :  { %700 = vmax.xlane.f32.xlu1 %v699_v53  ;;  %v696_v54 = vsel %vm208_vm1, %v694_v52, -inf }
 0x26f   :  { %697 = vmax.xlane.f32.xlu0 %v696_v54 }
 0x27f   :  { %3988 = vrot.lane.b32.xlu1 %v4334_v21, %s4194_s22 }
 0x285   :  { %3983 = vrot.lane.b32.xlu0 %v4320_v17, %s4194_s22 }
 0x2ef   :  { %v299_v55 = vpop.xlane.xlu0 %298 }
 0x2f0   :  { %v301_v56 = vsub.f32 %v293_v38, %v299_v55  ;;  %v296_v57 = vpop.xlane.xlu1 %295 }
 0x2f1   :  { %v300_v58 = vsub.f32 %v292_v40, %v296_v57 }
 0x2f2   :  { %v304_v59 = vmul.f32 1.442695, %v301_v56 }
 0x2f3   :  { %v302_v60 = vmul.f32 1.442695, %v300_v58 }
 0x2f4   :  { %4047 = vpow2.f32 %v304_v59  ;;  %v496_v61 = vpop.xlane.xlu0 %495  ;;  %v499_v62 = vpop.xlane.xlu1 %498 }
 0x2f5   :  { %4049 = vpow2.f32 %v302_v60  ;;  %v500_v63 = vsub.f32 %v492_v46, %v496_v61  ;;  %v501_v0 = vsub.f32 %v493_v44, %v499_v62 }
 0x2f7   :  { %v502_v1 = vmul.f32 1.442695, %v500_v63  ;;  %v504_v2 = vmul.f32 1.442695, %v501_v0 }
 0x2f9   :  { %4051 = vpow2.f32 %v502_v1 }
 0x2fa   :  { %4053 = vpow2.f32 %v504_v2 }
 0x2fb   :  { %v701_v3 = vpop.xlane.xlu1 %700 }
 0x2fc   :  { %v698_v4 = vpop.xlane.xlu0 %697  ;;  %v703_v34 = vsub.f32 %v695_v50, %v701_v3 }
 0x2fd   :  { %v702_v5 = vsub.f32 %v694_v52, %v698_v4 }
 0x2fe   :  { %v4048_v7 = vpop.eup %4047  ;;  %v706_v35 = vmul.f32 1.442695, %v703_v34  ;;  %v83_v34 = vld [vmem:[%s4772_s3 + $0x18] sm:$0xff] }
 0x2ff   :  { %v4050_v11 = vpop.eup %4049  ;;  %v704_v12 = vmul.f32 1.442695, %v702_v5  ;;  %v3989_v13 = vpop.permute.xlu1 %3988  ;;  %v309_v14 = vsel %vm208_vm1, %v4048_v7, 0.0 }
 0x300   :  { %v3991_v15 = vunpack.i.h.bf16 %v3989_v13  ;;  %v3984_v16 = vpop.permute.xlu0 %3983  ;;  %310 = vadd.xlane.f32.xlu1 %v309_v14  ;;  %v306_v19 = vsel %vm208_vm1, %v4050_v11, 0.0  ;;  %v3990_v22 = vunpack.i.l.bf16 %v3989_v13 }
 0x301   :  { %4055 = vpow2.f32 %v704_v12  ;;  %v3986_v23 = vunpack.i.h.bf16 %v3984_v16  ;;  %v3985_v24 = vunpack.i.l.bf16 %v3984_v16  ;;  %307 = vadd.xlane.f32.xlu0 %v306_v19 }
 0x302   :  { %v3798_v30 = vpack.c.bf16 %v3991_v15, %v3990_v22  ;;  %4057 = vpow2.f32 %v706_v35 }
 0x303   :  { %v4052_v25 = vpop.eup %4051  ;;  %v3788_v27 = vpack.c.bf16 %v3986_v23, %v3985_v24 }
 0x304   :  { %v4054_v28 = vpop.eup %4053  ;;  %v506_v29 = vsel %vm208_vm1, %v4052_v25, 0.0 }
 0x305   :  { %3789 = vmatprep.subr.bf16.mxu1 %v3788_v27  ;;  %507 = vadd.xlane.f32.xlu0 %v506_v29  ;;  %v509_v31 = vsel %vm208_vm1, %v4054_v28, 0.0 }
 0x306   :  { %510 = vadd.xlane.f32.xlu1 %v509_v31  ;;  %3791 = vmatpush3.bf16.msra.mxu1 %v3788_v27 }
 0x307   :  { %3799 = vmatprep.subr.bf16.mxu1 %v3798_v30 }
 0x30b   :  { %v4056_v32 = vpop.eup %4055 }
 0x30c   :  { %v708_v33 = vsel %vm208_vm1, %v4056_v32, 0.0  ;;  %v4058_v36 = vpop.eup %4057 }
 0x30d   :  { %709 = vadd.xlane.f32.xlu0 %v708_v33  ;;  %v711_v37 = vsel %vm208_vm1, %v4058_v36, 0.0  ;;  %v82_v33 = vld [vmem:[%s4772_s3 + $0x10] sm:$0xff] }
 0x317   :  { %3993 = vrot.lane.b32.xlu1 %v4320_v17, %s4195_s23 }
 0x323   :  { %3998 = vrot.lane.b32.xlu0 %v4334_v21, %s4191_s19 }
 0x327   :  { %807 = vrot.lane.b32.xlu0 %v4322_v18, %s4193_s21 }
 0x33b   :  { %712 = vadd.xlane.f32.xlu1 %v711_v37 }
 0x34c   :  { %805 = vrot.lane.b32.xlu1 %v4324_v20, %s4193_s21 }
 0x38d   :  { %v311_v38 = vpop.xlane.xlu1 %310 }
 0x38e   :  { %4059 = vrcp.f32 %v311_v38  ;;  %v308_v39 = vpop.xlane.xlu0 %307  ;;  %v3822_v38 = vpack.c.bf16 %v83_v34, %v82_v33  ;;  %v90_v33 = vld [vmem:[%s4775_s6 + $0x8] sm:$0xff] }
 0x38f   :  { %4061 = vrcp.f32 %v308_v39 }
 0x392   :  { %v508_v17 = vpop.xlane.xlu0 %507 }
 0x393   :  { %4063 = vrcp.f32 %v508_v17  ;;  %v511_v40 = vpop.xlane.xlu1 %510  ;;  %v81_v17 = vld [vmem:[%s4772_s3 + $0x8] sm:$0xff] }
 0x394   :  { %4065 = vrcp.f32 %v511_v40 }
 0x397   :  { %v3994_v41 = vpop.permute.xlu1 %3993 }
 0x398   :  { %v4060_v42 = vpop.eup %4059  ;;  %v3996_v43 = vunpack.i.h.bf16 %v3994_v41  ;;  %v3995_v44 = vunpack.i.l.bf16 %v3994_v41 }
 0x399   :  { %v4062_v18 = vpop.eup %4061  ;;  %v315_v47 = vmul.f32 %v4060_v42, %v4048_v7 }
 0x39a   :  { %v710_v45 = vpop.xlane.xlu0 %709  ;;  %v313_v46 = vmul.f32 %v4062_v18, %v4050_v11  ;;  %v3808_v48 = vpack.c.bf16 %v3996_v43, %v3995_v44 }
 0x39b   :  { %4067 = vrcp.f32 %v710_v45  ;;  %v1201_v45 = vlaneseq }
 0x39c   :  { %3525 = vmatprep.mubr.msk.f32.mxu1 %vm208_vm1, %v313_v46 }
 0x39d   :  { %v4064_v20 = vpop.eup %4063  ;;  %3526 = vmatmul.mubr.msk.f32.vlgmr.msra.gmra.mrb[2].mxu1 %vm208_vm1, %v315_v47  ;;  %v4427_v46 = vshrl.u32 %v1201_v45, 7 }
 0x39e   :  { %v4066_v49 = vpop.eup %4065  ;;  %3801 = vmatpush3.bf16.msra.mxu1 %v3798_v30  ;;  %v3999_v50 = vpop.permute.xlu0 %3998  ;;  %v513_v51 = vmul.f32 %v4064_v20, %v4052_v25  ;;  %v4433_v20 = vld [vmem:[%s4776_s7] sm:$0x3f] }
 0x39f   :  { %v515_v52 = vmul.f32 %v4066_v49, %v4054_v28  ;;  %v4001_v53 = vunpack.i.h.bf16 %v3999_v50  ;;  %v4000_v54 = vunpack.i.l.bf16 %v3999_v50  ;;  %3809 = vmatprep.subr.bf16.mxu1 %v3808_v48  ;;  %v1203_v47 = vsub.s32 0, %v4427_v46 }
 0x3a0   :  { %3539 = vmatprep.mubr.msk.f32.mxu1 %vm208_vm1, %v513_v51  ;;  %v1276_v45 = vsub.s32 3, %v4427_v46 }
 0x3a1   :  { %v3812_v55 = vpack.c.bf16 %v4001_v53, %v4000_v54  ;;  %3540 = vmatmul.mubr.msk.f32.vlgmr.msra.gmra.mrb[4].mxu1 %vm208_vm1, %v515_v52 }
 0x3a2   :  { %3811 = vmatpush3.bf16.msra.mxu1 %v3808_v48  ;;  %v808_v62 = vpop.permute.xlu0 %807  ;;  %v1204_v48 = vrot.slane %v4433_v20, %v1203_v47 }
 0x3a3   :  { %3814 = vmatprep.subr.msk.bf16.mxu1 %vm4342_vm2, %v3812_v55 }
 0x3a5   :  { %v4068_v56 = vpop.eup %4067 }
 0x3a6   :  { %v715_v57 = vmul.f32 %v4068_v56, %v4056_v32 }
 0x3a8   :  { %3553 = vmatprep.mubr.msk.f32.mxu1 %vm208_vm1, %v715_v57 }
 0x3c8   :  { %v713_v58 = vpop.xlane.xlu1 %712 }
 0x3c9   :  { %4069 = vrcp.f32 %v713_v58 }
 0x3cc   :  { %v806_v61 = vpop.permute.xlu1 %805 }
 0x3d3   :  { %v4070_v59 = vpop.eup %4069 }
 0x3d4   :  { %v717_v60 = vmul.f32 %v4070_v59, %v4058_v36 }
 0x3d6   :  { %3554 = vmatmul.mubr.msk.f32.vlgmr.msra.gmra.mrb[6].mxu1 %vm208_vm1, %v717_v60 }
 0x3d7   :  { %3817 = vmatpush3.bf16.xpose.msk.msra.mxu1 %vm4342_vm2, %v3812_v55  ;;  %3560 = vmatprep.mubr.msk.f32.mxu1 %vm208_vm1, %v806_v61 }
 0x3de   :  { %3561 = vmatmul.mubr.msk.f32.vlgmr.msra.gmra.mrb[8].mxu1 %vm208_vm1, %v808_v62 }
 0x470   :  { %v3527_v63 = vpop.f32.mrb[2].mxu1 }
 0x471   :  { %v394_v0 = vpop.f32.mrb[3].mxu1 }
 0x474   :  { %v3541_v1 = vpop.f32.mrb[4].mxu1 }
 0x475   :  { %v594_v2 = vpop.f32.mrb[5].mxu1 }
 0x4a9   :  { %v3555_v3 = vpop.f32.mrb[6].mxu1 }
 0x4aa   :  { %v796_v4 = vpop.f32.mrb[7].mxu1 }
 0x4b1   :  { %v3562_v5 = vpop.f32.mrb[8].mxu1 }
 0x4b2   :  { %v897_v7 = vmul.f32 0.25, %v3562_v5  ;;  %v887_v11 = vpop.f32.mrb[9].mxu1 }
 0x4b3   :  { %v896_v12 = vmul.f32 0.25, %v887_v11 }
 0x4b4   :  { %v901_v13 = vsel %vm208_vm1, %v897_v7, -inf }
 0x4b5   :  { %902 = vmax.xlane.f32.xlu0 %v901_v13  ;;  %v898_v14 = vsel %vm208_vm1, %v896_v12, -inf }
 0x4b6   :  { %899 = vmax.xlane.f32.xlu1 %v898_v14 }
 0x542   :  { %v903_v15 = vpop.xlane.xlu0 %902 }
 0x543   :  { %v905_v16 = vsub.f32 %v897_v7, %v903_v15  ;;  %v900_v19 = vpop.xlane.xlu1 %899 }
 0x544   :  { %v904_v22 = vsub.f32 %v896_v12, %v900_v19 }
 0x545   :  { %v908_v23 = vmul.f32 1.442695, %v905_v16 }
 0x546   :  { %v906_v24 = vmul.f32 1.442695, %v904_v22 }
 0x547   :  { %4071 = vpow2.f32 %v908_v23 }
 0x548   :  { %4073 = vpow2.f32 %v906_v24 }
 0x551   :  { %v4072_v25 = vpop.eup %4071 }
 0x552   :  { %v4074_v27 = vpop.eup %4073  ;;  %v913_v28 = vsel %vm208_vm1, %v4072_v25, 0.0 }
 0x553   :  { %914 = vadd.xlane.f32.xlu1 %v913_v28  ;;  %v910_v29 = vsel %vm208_vm1, %v4074_v27, 0.0 }
 0x554   :  { %911 = vadd.xlane.f32.xlu0 %v910_v29  ;;  %v86_v29 = vld [vmem:[%s4773_s4 + $0x10] sm:$0xff] }
 0x56a   :  { %4003 = vrot.lane.b32.xlu0 %v4334_v21, %s4195_s23  ;;  %v80_v21 = vld [vmem:[%s4772_s3] sm:$0xff] }
 0x56b   :  { %v3826_v18 = vpack.c.bf16 %v81_v17, %v80_v21 }
 0x5e0   :  { %v915_v30 = vpop.xlane.xlu1 %914 }
 0x5e1   :  { %4075 = vrcp.f32 %v915_v30  ;;  %v912_v31 = vpop.xlane.xlu0 %911  ;;  %v87_v30 = vld [vmem:[%s4773_s4 + $0x18] sm:$0xff] }
 0x5e2   :  { %4077 = vrcp.f32 %v912_v31  ;;  %v3834_v31 = vpack.c.bf16 %v87_v30, %v86_v29  ;;  %v1391_v29 = vsub.s32 1, %v4427_v46 }
 0x5e4   :  { %v1392_v30 = vrot.slane %v4433_v20, %v1391_v29 }
 0x5e5   :  { %v4004_v32 = vpop.permute.xlu0 %4003 }
 0x5e6   :  { %v4006_v35 = vunpack.i.h.bf16 %v4004_v32  ;;  %v4005_v36 = vunpack.i.l.bf16 %v4004_v32  ;;  %v89_v32 = vld [vmem:[%s4775_s6] sm:$0xff] }
 0x5e7   :  { %v3838_v34 = vpack.c.bf16 %v90_v33, %v89_v32 }
 0x5e8   :  { %v3818_v37 = vpack.c.bf16 %v4006_v35, %v4005_v36 }
 0x5ea   :  { %3819 = vmatprep.subr.bf16.mxu0 %v3818_v37 }
 0x5eb   :  { %v4076_v39 = vpop.eup %4075  ;;  %3821 = vmatpush3.bf16.msra.mxu0 %v3818_v37 }
 0x5ec   :  { %v4078_v40 = vpop.eup %4077  ;;  %3823 = vmatprep.subr.bf16.mxu0 %v3822_v38  ;;  %v919_v42 = vmul.f32 %v4076_v39, %v4072_v25  ;;  %v84_v25 = vld [vmem:[%s4773_s4] sm:$0xff] }
 0x5ed   :  { %v917_v41 = vmul.f32 %v4078_v40, %v4074_v27  ;;  %v85_v27 = vld [vmem:[%s4773_s4 + $0x8] sm:$0xff] }
 0x5ee   :  { %v3830_v28 = vpack.c.bf16 %v85_v27, %v84_v25 }
 0x5ef   :  { %3567 = vmatprep.mubr.msk.f32.mxu0 %vm208_vm1, %v917_v41 }
 0x5f0   :  { %3568 = vmatmul.mubr.msk.f32.vlgmr.msra.gmra.mrb[8].mxu0 %vm208_vm1, %v919_v42  ;;  %3831 = vmatprep.subr.bf16.mxu1 %v3830_v28 }
 0x5f1   :  { %3825 = vmatpush3.bf16.msra.mxu0 %v3822_v38  ;;  %3574 = vmatprep.mubr.msk.f32.mxu0 %vm208_vm1, %v796_v4 }
 0x5f2   :  { %3827 = vmatprep.subr.bf16.mxu0 %v3826_v18  ;;  %3833 = vmatpush3.bf16.msra.mxu1 %v3830_v28 }
 0x5f3   :  { %3835 = vmatprep.subr.bf16.mxu1 %v3834_v31 }
 0x5f4   :  { %3575 = vmatmul.mubr.msk.f32.vlgmr.msra.gmra.mrb[10].mxu0 %vm208_vm1, %v3555_v3 }
 0x5f5   :  { %3829 = vmatpush3.bf16.msra.mxu0 %v3826_v18 }
 0x5f6   :  { %3837 = vmatpush3.bf16.msra.mxu1 %v3834_v31 }
 0x5f7   :  { %3839 = vmatprep.subr.bf16.mxu1 %v3838_v34 }
 0x6c3   :  { %v3569_v43 = vpop.f32.mrb[8].mxu0 }
 0x6c4   :  { %v998_v44 = vpop.f32.mrb[9].mxu0 }
 0x6c5   :  { %3577 = vmatprep.mubr.msk.f32.mxu0 %vm208_vm1, %v998_v44 }
 0x6c6   :  { %3578 = vmatmul.mubr.msk.f32.gmra.mrb[12].mxu0 %vm208_vm1, %v3569_v43  ;;  %v1268_v43 = vsub.s32 2, %v4427_v46 }
 0x6c7   :  { %3584 = vmatprep.mubr.msk.f32.mxu0 %vm208_vm1, %v394_v0 }
 0x6ca   :  { %3585 = vmatmul.mubr.msk.f32.vlgmr.msra.gmra.mrb[10].mxu0 %vm208_vm1, %v3527_v63 }
 0x6cb   :  { %3587 = vmatprep.mubr.msk.f32.mxu0 %vm208_vm1, %v594_v2 }
 0x6ce   :  { %3588 = vmatmul.mubr.msk.f32.gmra.mrb[12].mxu0 %vm208_vm1, %v3541_v1 }
 0x79d   :  { %v3586_v49 = vpop.f32.mrb[10].mxu0 }
 0x79e   :  { %v1206_v50 = vadd.f32 %v3586_v49, %v1204_v48  ;;  %v1182_v51 = vpop.f32.mrb[11].mxu0 }
 0x79f   :  { %v1205_v52 = vadd.f32 %v1204_v48, %v1182_v51  ;;  %v1277_v51 = vrot.slane %v4433_v20, %v1276_v45 }
 0x7a0   :  { %v1210_v53 = vadd.f32 %v1206_v50, %v4304_v8 }
 0x7a1   :  { %v3589_v54 = vpop.f32.mrb[12].mxu0  ;;  %v1209_v57 = vadd.f32 %v1205_v52, %v4300_v6 }
 0x7a2   :  { %v1192_v55 = vpop.f32.mrb[13].mxu0  ;;  %v1216_v56 = vsel %vm104_vm0, %v1210_v53, 0.0  ;;  %v1208_v59 = vadd.f32 %v3589_v54, %v1204_v48 }
 0x7a3   :  { %v1207_v58 = vadd.f32 %v1204_v48, %v1192_v55  ;;  %1217 = vadd.xlane.f32.xlu1 %v1216_v56  ;;  %v1213_v60 = vsel %vm104_vm0, %v1209_v57, 0.0  ;;  %v1269_v48 = vrot.slane %v4433_v20, %v1268_v43 }
 0x7a4   :  { %v1212_v63 = vadd.f32 %v1208_v59, %v4312_v10  ;;  %v91_v59 = vld [vmem:[%s4775_s6 + $0x10] sm:$0xff] }
 0x7a5   :  { %v1211_v61 = vadd.f32 %v1207_v58, %v4306_v9 }
 0x7a6   :  { %v1222_v8 = vsel %vm104_vm0, %v1212_v63, 0.0 }
 0x7a7   :  { %1214 = vadd.xlane.f32.xlu1 %v1213_v60  ;;  %v1219_v62 = vsel %vm104_vm0, %v1211_v61, 0.0  ;;  %v92_v60 = vld [vmem:[%s4775_s6 + $0x18] sm:$0xff] }
 0x7ab   :  { %1220 = vadd.xlane.f32.xlu1 %v1219_v62 }
 0x7af   :  { %1223 = vadd.xlane.f32.xlu1 %v1222_v8 }
 0x830   :  { %v1218_v0 = vpop.xlane.xlu1 %1217 }
 0x831   :  { %v1227_v1 = vmul.f32 0.03125, %v1218_v0 }
 0x833   :  { %v1231_v3 = vsub.f32 %v1210_v53, %v1227_v1  ;;  %v3842_v1 = vpack.c.bf16 %v92_v60, %v91_v59 }
 0x834   :  { %v1215_v2 = vpop.xlane.xlu1 %1214 }
 0x835   :  { %v1226_v6 = vmul.f32 0.03125, %v1215_v2  ;;  %v1235_v13 = vmul.f32 %v1231_v3, %v1231_v3 }
 0x837   :  { %v1230_v4 = vsub.f32 %v1209_v57, %v1226_v6  ;;  %v1241_v19 = vsel %vm104_vm0, %v1235_v13, 0.0  ;;  %v93_v6 = vld [vmem:[%s4775_s6 + $0x20] sm:$0xff] }
 0x838   :  { %v1221_v5 = vpop.xlane.xlu1 %1220 }
 0x839   :  { %v1228_v7 = vmul.f32 0.03125, %v1221_v5  ;;  %v1234_v11 = vmul.f32 %v1230_v4, %v1230_v4 }
 0x83b   :  { %v1232_v12 = vsub.f32 %v1211_v61, %v1228_v7  ;;  %v1238_v9 = vsel %vm104_vm0, %v1234_v11, 0.0  ;;  %v95_v7 = vld [vmem:[%s4775_s6 + $0x30] sm:$0xff]  ;;  %v96_v11 = vld [vmem:[%s4775_s6 + $0x38] sm:$0xff] }
 0x83c   :  { %1239 = vadd.xlane.f32.xlu1 %v1238_v9  ;;  %v1224_v14 = vpop.xlane.xlu1 %1223  ;;  %v3260_v9 = vld [vmem:[%s4774_s5] ss:$0 sm:$0xff] }
 0x83d   :  { %v1229_v10 = vmul.f32 0.03125, %v1224_v14  ;;  %v1236_v15 = vmul.f32 %v1232_v12, %v1232_v12 }
 0x83f   :  { %v1233_v16 = vsub.f32 %v1212_v63, %v1229_v10  ;;  %v1244_v22 = vsel %vm104_vm0, %v1236_v15, 0.0 }
 0x840   :  { %1242 = vadd.xlane.f32.xlu1 %v1241_v19  ;;  %1245 = vadd.xlane.f32.xlu0 %v1244_v22 }
 0x841   :  { %v1237_v23 = vmul.f32 %v1233_v16, %v1233_v16 }
 0x843   :  { %v1247_v24 = vsel %vm104_vm0, %v1237_v23, 0.0 }
 0x844   :  { %1248 = vadd.xlane.f32.xlu1 %v1247_v24 }
 0x8c9   :  { %v1240_v35 = vpop.xlane.xlu1 %1239 }
 0x8ca   :  { %v1250_v36 = vmul.f32 0.03125, %v1240_v35 }
 0x8cc   :  { %v1254_v37 = vadd.f32 1e-05, %v1250_v36 }
 0x8cd   :  { %v1246_v38 = vpop.xlane.xlu0 %1245  ;;  %v1243_v39 = vpop.xlane.xlu1 %1242 }
 0x8ce   :  { %4079 = vrsqrt.f32 %v1254_v37  ;;  %v1252_v21 = vmul.f32 0.03125, %v1246_v38  ;;  %v1251_v17 = vmul.f32 0.03125, %v1243_v39 }
 0x8d0   :  { %v1256_v40 = vadd.f32 1e-05, %v1252_v21  ;;  %v1255_v41 = vadd.f32 1e-05, %v1251_v17 }
 0x8d1   :  { %v1249_v42 = vpop.xlane.xlu1 %1248 }
 0x8d2   :  { %4081 = vrsqrt.f32 %v1256_v40  ;;  %v1253_v18 = vmul.f32 0.03125, %v1249_v42 }
 0x8d3   :  { %4083 = vrsqrt.f32 %v1255_v41 }
 0x8d4   :  { %v1257_v44 = vadd.f32 1e-05, %v1253_v18 }
 0x8d6   :  { %4085 = vrsqrt.f32 %v1257_v44 }
 0x8d8   :  { %v4080_v49 = vpop.eup %4079 }
 0x8d9   :  { %v1262_v50 = vmul.f32 %v4080_v49, %v1230_v4 }
 0x8db   :  { %v1270_v52 = vmul.f32 %v1269_v48, %v1262_v50 }
 0x8dc   :  { %v4082_v53 = vpop.eup %4081 }
 0x8dd   :  { %v4084_v54 = vpop.eup %4083  ;;  %v1278_v55 = vadd.f32 %v1277_v51, %v1270_v52  ;;  %v1264_v56 = vmul.f32 %v4082_v53, %v1232_v12  ;;  %v3850_v12 = vpack.c.bf16 %v96_v11, %v95_v7  ;;  %v3272_v7 = vld [vmem:[%s4770_s1 + $0x38] sm:$0xff] }
 0x8de   :  { %v1263_v57 = vmul.f32 %v4084_v54, %v1231_v3  ;;  %v94_v3 = vld [vmem:[%s4775_s6 + $0x28] sm:$0xff] }
 0x8df   :  { %3598 = vmatprep.mubr.msk.f32.mxu1 %vm104_vm0, %v1278_v55  ;;  %v1272_v58 = vmul.f32 %v1269_v48, %v1264_v56  ;;  %v3846_v5 = vpack.c.bf16 %v94_v3, %v93_v6  ;;  %v3269_v6 = vld [vmem:[%s4770_s1 + $0x20] sm:$0xff]  ;;  %v3270_v3 = vld [vmem:[%s4770_s1 + $0x28] sm:$0xff] }
 0x8e0   :  { %v4086_v61 = vpop.eup %4085  ;;  %v1271_v62 = vmul.f32 %v1269_v48, %v1263_v57 }
 0x8e1   :  { %v1280_v63 = vadd.f32 %v1277_v51, %v1272_v58  ;;  %v1265_v8 = vmul.f32 %v4086_v61, %v1233_v16 }
 0x8e2   :  { %v1279_v0 = vadd.f32 %v1277_v51, %v1271_v62 }
 0x8e3   :  { %v1273_v2 = vmul.f32 %v1269_v48, %v1265_v8 }
 0x8e4   :  { %3599 = vmatmul.mubr.msk.f32.vlgmr.msra.gmra.mrb[10].mxu1 %vm104_vm0, %v1279_v0 }
 0x8e5   :  { %3601 = vmatprep.mubr.msk.f32.mxu1 %vm104_vm0, %v1280_v63  ;;  %v1281_v4 = vadd.f32 %v1277_v51, %v1273_v2  ;;  %3841 = vmatpush3.bf16.msra.mxu1 %v3838_v34 }
 0x8e6   :  { %3843 = vmatprep.subr.bf16.mxu1 %v3842_v1 }
 0x8e8   :  { %3602 = vmatmul.mubr.msk.f32.gmra.mrb[12].mxu1 %vm104_vm0, %v1281_v4 }
 0x8e9   :  { %3845 = vmatpush3.bf16.msra.mxu1 %v3842_v1 }
 0x8ea   :  { %3847 = vmatprep.subr.bf16.mxu1 %v3846_v5 }
 0x8ed   :  { %3849 = vmatpush3.bf16.msra.mxu1 %v3846_v5  ;;  %v3271_v5 = vld [vmem:[%s4770_s1 + $0x30] sm:$0xff] }
 0x8ee   :  { %3851 = vmatprep.subr.bf16.mxu1 %v3850_v12  ;;  %v3858_v11 = vpack.c.bf16 %v3272_v7, %v3271_v5 }
 0x8f1   :  { %3853 = vmatpush3.bf16.msra.mxu1 %v3850_v12 }
 0x9b7   :  { %v3600_v13 = vpop.f32.mrb[10].mxu1 }
 0x9b8   :  { %v1372_v14 = vadd.f32 %v3600_v13, %v3260_v9  ;;  %v1366_v10 = vpop.f32.mrb[11].mxu1 }
 0x9b9   :  { %v1367_v15 = vadd.f32 %v3260_v9, %v1366_v10 }
 0x9ba   :  { %v1386_v22 = vmax.f32 %v1372_v14, 0.0 }
 0x9bb   :  { %v1385_v16 = vmax.f32 %v1367_v15, 0.0  ;;  %v3603_v19 = vpop.f32.mrb[12].mxu1 }
 0x9bc   :  { %v1382_v23 = vadd.f32 %v3603_v19, %v3260_v9  ;;  %v1376_v24 = vpop.f32.mrb[13].mxu1 }
 0x9bd   :  { %v1377_v25 = vadd.f32 %v3260_v9, %v1376_v24  ;;  %3620 = vmatprep.mubr.msk.f32.mxu1 %vm1393_vm3, %v1385_v16 }
 0x9be   :  { %3621 = vmatmul.mubr.msk.f32.vlgmr.msra.gmra.mrb[14].mxu1 %vm1393_vm3, %v1386_v22  ;;  %v1388_v28 = vmax.f32 %v1382_v23, 0.0 }
 0x9bf   :  { %v1387_v27 = vmax.f32 %v1377_v25, 0.0  ;;  %v1549_v25 = vsub.s32 4, %v4427_v46 }
 0x9c1   :  { %3623 = vmatprep.mubr.msk.f32.mxu1 %vm1393_vm3, %v1387_v27 }
 0x9c2   :  { %3624 = vmatmul.mubr.msk.f32.gmra.mrb[16].mxu1 %vm1393_vm3, %v1388_v28  ;;  %v1557_v28 = vsub.s32 5, %v4427_v46  ;;  %v3123_v46 = vld [vmem:[%s4779_s10 + $0x10] sm:$0xff] }
 0xa91   :  { %v3622_v31 = vpop.f32.mrb[14].mxu1 }
 0xa92   :  { %v1478_v32 = vadd.f32 %v3622_v31, %v1392_v30  ;;  %v1472_v33 = vpop.f32.mrb[15].mxu1 }
 0xa93   :  { %v1473_v34 = vadd.f32 %v1472_v33, %v1392_v30  ;;  %v1558_v33 = vrot.slane %v4433_v20, %v1557_v28 }
 0xa94   :  { %v1492_v35 = vadd.f32 %v1478_v32, %v1279_v0 }
 0xa95   :  { %v3625_v36 = vpop.f32.mrb[16].mxu1  ;;  %v1491_v39 = vadd.f32 %v1473_v34, %v1278_v55 }
 0xa96   :  { %v1482_v37 = vpop.f32.mrb[17].mxu1  ;;  %v1498_v38 = vsel %vm104_vm0, %v1492_v35, 0.0  ;;  %v1488_v17 = vadd.f32 %v3625_v36, %v1392_v30 }
 0xa97   :  { %v1483_v21 = vadd.f32 %v1482_v37, %v1392_v30  ;;  %1499 = vadd.xlane.f32.xlu1 %v1498_v38  ;;  %v1495_v40 = vsel %vm104_vm0, %v1491_v39, 0.0  ;;  %v1550_v30 = vrot.slane %v4433_v20, %v1549_v25 }
 0xa98   :  { %v1494_v18 = vadd.f32 %v1488_v17, %v1281_v4  ;;  %v3854_v4 = vpack.c.bf16 %v3270_v3, %v3269_v6 }
 0xa99   :  { %v1493_v41 = vadd.f32 %v1483_v21, %v1280_v63 }
 0xa9a   :  { %v1504_v44 = vsel %vm104_vm0, %v1494_v18, 0.0  ;;  %3855 = vmatprep.subr.bf16.mxu0 %v3854_v4 }
 0xa9b   :  { %1496 = vadd.xlane.f32.xlu1 %v1495_v40  ;;  %v1501_v42 = vsel %vm104_vm0, %v1493_v41, 0.0  ;;  %3857 = vmatpush3.bf16.msra.mxu0 %v3854_v4 }
 0xa9c   :  { %3859 = vmatprep.subr.bf16.mxu0 %v3858_v11 }
 0xa9f   :  { %1502 = vadd.xlane.f32.xlu1 %v1501_v42  ;;  %3861 = vmatpush3.bf16.msra.mxu0 %v3858_v11 }
 0xaa3   :  { %1505 = vadd.xlane.f32.xlu1 %v1504_v44 }
 0xb24   :  { %v1500_v48 = vpop.xlane.xlu1 %1499 }
 0xb25   :  { %v1508_v49 = vmul.f32 0.03125, %v1500_v48  ;;  %v3292_v48 = vld [vmem:[%s4771_s2 + $0x1] ss:$0 sm:$0xff] }
 0xb27   :  { %v1512_v52 = vsub.f32 %v1492_v35, %v1508_v49 }
 0xb28   :  { %v1497_v50 = vpop.xlane.xlu1 %1496 }
 0xb29   :  { %v1507_v51 = vmul.f32 0.03125, %v1497_v50  ;;  %v1516_v59 = vmul.f32 %v1512_v52, %v1512_v52 }
 0xb2b   :  { %v1511_v53 = vsub.f32 %v1491_v39, %v1507_v51  ;;  %v1522_v8 = vsel %vm104_vm0, %v1516_v59, 0.0 }
 0xb2c   :  { %v1503_v54 = vpop.xlane.xlu1 %1502 }
 0xb2d   :  { %v1509_v55 = vmul.f32 0.03125, %v1503_v54  ;;  %v1515_v56 = vmul.f32 %v1511_v53, %v1511_v53 }
 0xb2f   :  { %v1513_v57 = vsub.f32 %v1493_v41, %v1509_v55  ;;  %v1519_v58 = vsel %vm104_vm0, %v1515_v56, 0.0 }
 0xb30   :  { %1520 = vadd.xlane.f32.xlu1 %v1519_v58  ;;  %v1506_v60 = vpop.xlane.xlu1 %1505 }
 0xb31   :  { %v1510_v61 = vmul.f32 0.03125, %v1506_v60  ;;  %v1517_v62 = vmul.f32 %v1513_v57, %v1513_v57 }
 0xb33   :  { %v1514_v63 = vsub.f32 %v1494_v18, %v1510_v61  ;;  %v1525_v0 = vsel %vm104_vm0, %v1517_v62, 0.0 }
 0xb34   :  { %1523 = vadd.xlane.f32.xlu1 %v1522_v8  ;;  %1526 = vadd.xlane.f32.xlu0 %v1525_v0 }
 0xb35   :  { %v1518_v1 = vmul.f32 %v1514_v63, %v1514_v63 }
 0xb37   :  { %v1528_v2 = vsel %vm104_vm0, %v1518_v1, 0.0 }
 0xb38   :  { %1529 = vadd.xlane.f32.xlu1 %v1528_v2 }
 0xbbd   :  { %v1521_v12 = vpop.xlane.xlu1 %1520 }
 0xbbe   :  { %v1531_v9 = vmul.f32 0.03125, %v1521_v12 }
 0xbc0   :  { %v1535_v13 = vadd.f32 1e-05, %v1531_v9 }
 0xbc1   :  { %v1527_v14 = vpop.xlane.xlu0 %1526  ;;  %v1524_v10 = vpop.xlane.xlu1 %1523 }
 0xbc2   :  { %4087 = vrsqrt.f32 %v1535_v13  ;;  %v1533_v15 = vmul.f32 0.03125, %v1527_v14  ;;  %v1532_v16 = vmul.f32 0.03125, %v1524_v10 }
 0xbc4   :  { %v1537_v19 = vadd.f32 1e-05, %v1533_v15  ;;  %v1536_v22 = vadd.f32 1e-05, %v1532_v16 }
 0xbc5   :  { %v1530_v23 = vpop.xlane.xlu1 %1529 }
 0xbc6   :  { %4089 = vrsqrt.f32 %v1537_v19  ;;  %v1534_v24 = vmul.f32 0.03125, %v1530_v23 }
 0xbc7   :  { %4091 = vrsqrt.f32 %v1536_v22 }
 0xbc8   :  { %v1538_v27 = vadd.f32 1e-05, %v1534_v24 }
 0xbca   :  { %4093 = vrsqrt.f32 %v1538_v27 }
 0xbcc   :  { %v4088_v31 = vpop.eup %4087 }
 0xbcd   :  { %v1543_v32 = vmul.f32 %v4088_v31, %v1511_v53 }
 0xbcf   :  { %v1551_v34 = vmul.f32 %v1550_v30, %v1543_v32 }
 0xbd0   :  { %v4090_v35 = vpop.eup %4089 }
 0xbd1   :  { %v4092_v36 = vpop.eup %4091  ;;  %v4537_v37 = vadd.f32 %v1558_v33, %v1551_v34  ;;  %v1545_v38 = vmul.f32 %v4090_v35, %v1513_v57 }
 0xbd2   :  { %v1544_v39 = vmul.f32 %v4092_v36, %v1512_v52 }
 0xbd3   :  { %3634 = vmatprep.mubr.msk.f32.mxu0 %vm104_vm0, %v4537_v37  ;;  %v1553_v21 = vmul.f32 %v1550_v30, %v1545_v38 }
 0xbd4   :  { %v4094_v17 = vpop.eup %4093  ;;  %v1552_v40 = vmul.f32 %v1550_v30, %v1544_v39 }
 0xbd5   :  { %v4541_v41 = vadd.f32 %v1558_v33, %v1553_v21  ;;  %v1546_v42 = vmul.f32 %v4094_v17, %v1514_v63 }
 0xbd6   :  { %v4543_v18 = vadd.f32 %v1558_v33, %v1552_v40 }
 0xbd7   :  { %v1554_v44 = vmul.f32 %v1550_v30, %v1546_v42 }
 0xbd8   :  { %3635 = vmatmul.mubr.msk.f32.vlgmr.msra.gmra.mrb[14].mxu0 %vm104_vm0, %v4543_v18 }
 0xbd9   :  { %3637 = vmatprep.mubr.msk.f32.mxu0 %vm104_vm0, %v4541_v41  ;;  %v4549_v20 = vadd.f32 %v1558_v33, %v1554_v44 }
 0xbdc   :  { %3638 = vmatmul.mubr.msk.f32.gmra.mrb[16].mxu0 %vm104_vm0, %v4549_v20 }
 0xcab   :  { %v3636_v49 = vpop.f32.mrb[14].mxu0 }
 0xcac   :  { %v1683_v50 = vadd.f32 %v3636_v49, %v3292_v48  ;;  %v1677_v51 = vpop.f32.mrb[15].mxu0 }
 0xcad   :  { %v1678_v52 = vadd.f32 %v3292_v48, %v1677_v51 }
 0xcaf   :  { %v3639_v53 = vpop.f32.mrb[16].mxu0  ;;  %3644 = vmatprep.mubr.msk.f32.mxu0 %vm208_vm1, %v1678_v52  ;;  %v4557_v54 = vpack.i.bf16 %v1683_v50, %v1678_v52 }
 0xcb0   :  { %v4559_v55 = vadd.f32 %v3639_v53, %v3292_v48  ;;  %v1687_v56 = vpop.f32.mrb[17].mxu0 }
 0xcb1   :  { %v4561_v57 = vadd.f32 %v3292_v48, %v1687_v56  ;;  %4008 = vrot.lane.b32.xlu0 %v4557_v54, %s4192_s20 }
 0xcb3   :  { %3658 = vmatprep.mubr.msk.f32.mxu1 %vm208_vm1, %v4561_v57  ;;  %v4569_v58 = vpack.i.bf16 %v4559_v55, %v4561_v57 }
 0xcb5   :  { %2098 = vrot.lane.b32.xlu0 %v1683_v50, %s4193_s21  ;;  %4013 = vrot.lane.b32.xlu1 %v4569_v58, %s4192_s20 }
 0xcb9   :  { %4018 = vrot.lane.b32.xlu1 %v4557_v54, %s4191_s19 }
 0xcbd   :  { %2096 = vrot.lane.b32.xlu1 %v1678_v52, %s4193_s21 }
 0xd23   :  { %v4009_v59 = vpop.permute.xlu0 %4008 }
 0xd24   :  { %v4011_v60 = vunpack.i.h.bf16 %v4009_v59  ;;  %v4010_v61 = vunpack.i.l.bf16 %v4009_v59 }
 0xd26   :  { %v3862_v62 = vpack.c.bf16 %v4011_v60, %v4010_v61 }
 0xd27   :  { %v4014_v63 = vpop.permute.xlu1 %4013  ;;  %v2099_v7 = vpop.permute.xlu0 %2098 }
 0xd28   :  { %v4016_v8 = vunpack.i.h.bf16 %v4014_v63  ;;  %v4015_v0 = vunpack.i.l.bf16 %v4014_v63  ;;  %3864 = vmatprep.subr.msk.bf16.mxu0 %vm4342_vm2, %v3862_v62 }
 0xd29   :  { %3867 = vmatpush3.bf16.xpose.msk.msra.mxu0 %vm4342_vm2, %v3862_v62 }
 0xd2a   :  { %v3872_v1 = vpack.c.bf16 %v4016_v8, %v4015_v0 }
 0xd2b   :  { %v4019_v2 = vpop.permute.xlu1 %4018 }
 0xd2c   :  { %v4021_v6 = vunpack.i.h.bf16 %v4019_v2  ;;  %v4020_v3 = vunpack.i.l.bf16 %v4019_v2  ;;  %3874 = vmatprep.subr.msk.bf16.mxu1 %vm4342_vm2, %v3872_v1 }
 0xd2d   :  { %3877 = vmatpush3.bf16.xpose.msk.msra.mxu1 %vm4342_vm2, %v3872_v1 }
 0xd2e   :  { %v3882_v4 = vpack.c.bf16 %v4021_v6, %v4020_v3 }
 0xd2f   :  { %v2097_v5 = vpop.permute.xlu1 %2096 }
 0xd30   :  { %3645 = vmatmul.mubr.msk.f32.vlgmr.msra.gmra.mrb[18].mxu0 %vm208_vm1, %v1683_v50  ;;  %3884 = vmatprep.subr.msk.bf16.mxu1 %vm4342_vm2, %v3882_v4 }
 0xd34   :  { %3659 = vmatmul.mubr.msk.f32.vlgmr.msra.gmra.mrb[18].mxu1 %vm208_vm1, %v4559_v55 }
 0xd35   :  { %3887 = vmatpush3.bf16.xpose.msk.msra.mxu1 %vm4342_vm2, %v3882_v4  ;;  %3672 = vmatprep.mubr.msk.f32.mxu1 %vm208_vm1, %v2097_v5 }
 0xd3c   :  { %3673 = vmatmul.mubr.msk.f32.vlgmr.msra.gmra.mrb[20].mxu1 %vm208_vm1, %v2099_v7 }
 0xe03   :  { %v3646_v11 = vpop.f32.mrb[18].mxu0 }
 0xe04   :  { %v1786_v12 = vmul.f32 0.25, %v3646_v11  ;;  %v1776_v9 = vpop.f32.mrb[19].mxu0 }
 0xe05   :  { %v1785_v13 = vmul.f32 0.25, %v1776_v9 }
 0xe06   :  { %v1790_v14 = vsel %vm208_vm1, %v1786_v12, -inf }
 0xe07   :  { %1791 = vmax.xlane.f32.xlu0 %v1790_v14  ;;  %v3660_v10 = vpop.f32.mrb[18].mxu1  ;;  %v1787_v15 = vsel %vm208_vm1, %v1785_v13, -inf }
 0xe08   :  { %1788 = vmax.xlane.f32.xlu1 %v1787_v15  ;;  %v1976_v16 = vpop.f32.mrb[19].mxu1  ;;  %v1986_v22 = vmul.f32 0.25, %v3660_v10 }
 0xe09   :  { %v1985_v19 = vmul.f32 0.25, %v1976_v16 }
 0xe0a   :  { %v1990_v27 = vsel %vm208_vm1, %v1986_v22, -inf }
 0xe0b   :  { %v1987_v23 = vsel %vm208_vm1, %v1985_v19, -inf }
 0xe0c   :  { %1988 = vmax.xlane.f32.xlu0 %v1987_v23 }
 0xe0f   :  { %v3674_v24 = vpop.f32.mrb[20].mxu1 }
 0xe10   :  { %v2188_v30 = vmul.f32 0.25, %v3674_v24  ;;  %v2178_v31 = vpop.f32.mrb[21].mxu1  ;;  %1991 = vmax.xlane.f32.xlu0 %v1990_v27 }
 0xe11   :  { %v2187_v32 = vmul.f32 0.25, %v2178_v31 }
 0xe12   :  { %v2192_v33 = vsel %vm208_vm1, %v2188_v30, -inf }
 0xe13   :  { %v2189_v34 = vsel %vm208_vm1, %v2187_v32, -inf }
 0xe14   :  { %2190 = vmax.xlane.f32.xlu1 %v2189_v34  ;;  %2193 = vmax.xlane.f32.xlu0 %v2192_v33 }
 0xe25   :  { %4023 = vrot.lane.b32.xlu1 %v4557_v54, %s4194_s22 }
 0xe94   :  { %v1792_v35 = vpop.xlane.xlu0 %1791 }
 0xe95   :  { %v1794_v36 = vsub.f32 %v1786_v12, %v1792_v35  ;;  %v1789_v38 = vpop.xlane.xlu1 %1788 }
 0xe96   :  { %v1793_v39 = vsub.f32 %v1785_v13, %v1789_v38 }
 0xe97   :  { %v1797_v21 = vmul.f32 1.442695, %v1794_v36 }
 0xe98   :  { %v1795_v17 = vmul.f32 1.442695, %v1793_v39 }
 0xe99   :  { %4095 = vpow2.f32 %v1797_v21  ;;  %v1989_v40 = vpop.xlane.xlu0 %1988 }
 0xe9a   :  { %4097 = vpow2.f32 %v1795_v17  ;;  %v1993_v42 = vsub.f32 %v1985_v19, %v1989_v40 }
 0xe9c   :  { %v1995_v44 = vmul.f32 1.442695, %v1993_v42 }
 0xe9d   :  { %v1992_v48 = vpop.xlane.xlu0 %1991 }
 0xe9e   :  { %4099 = vpow2.f32 %v1995_v44  ;;  %v1994_v49 = vsub.f32 %v1986_v22, %v1992_v48 }
 0xea0   :  { %v1997_v50 = vmul.f32 1.442695, %v1994_v49 }
 0xea1   :  { %v2191_v51 = vpop.xlane.xlu1 %2190  ;;  %v2194_v52 = vpop.xlane.xlu0 %2193 }
 0xea2   :  { %4101 = vpow2.f32 %v1997_v50  ;;  %v2196_v53 = vsub.f32 %v2188_v30, %v2194_v52  ;;  %v2195_v11 = vsub.f32 %v2187_v32, %v2191_v51 }
 0xea3   :  { %v4096_v56 = vpop.eup %4095 }
 0xea4   :  { %v4098_v59 = vpop.eup %4097  ;;  %v2199_v60 = vmul.f32 1.442695, %v2196_v53  ;;  %v1802_v61 = vsel %vm208_vm1, %v4096_v56, 0.0  ;;  %v2197_v12 = vmul.f32 1.442695, %v2195_v11 }
 0xea5   :  { %v4024_v62 = vpop.permute.xlu1 %4023  ;;  %1803 = vadd.xlane.f32.xlu0 %v1802_v61  ;;  %v1799_v63 = vsel %vm208_vm1, %v4098_v59, 0.0 }
 0xea6   :  { %v4026_v8 = vunpack.i.h.bf16 %v4024_v62  ;;  %v4025_v0 = vunpack.i.l.bf16 %v4024_v62  ;;  %1800 = vadd.xlane.f32.xlu1 %v1799_v63  ;;  %4103 = vpow2.f32 %v2199_v60 }
 0xea7   :  { %4105 = vpow2.f32 %v2197_v12 }
 0xea8   :  { %v4100_v1 = vpop.eup %4099  ;;  %v3868_v2 = vpack.c.bf16 %v4026_v8, %v4025_v0 }
 0xea9   :  { %v1999_v6 = vsel %vm208_vm1, %v4100_v1, 0.0 }
 0xeaa   :  { %3869 = vmatprep.subr.bf16.mxu0 %v3868_v2  ;;  %2000 = vadd.xlane.f32.xlu1 %v1999_v6 }
 0xeab   :  { %3871 = vmatpush3.bf16.msra.mxu0 %v3868_v2 }
 0xeac   :  { %v4102_v3 = vpop.eup %4101 }
 0xead   :  { %v2002_v4 = vsel %vm208_vm1, %v4102_v3, 0.0 }
 0xeae   :  { %2003 = vadd.xlane.f32.xlu0 %v2002_v4 }
 0xeb0   :  { %v4104_v5 = vpop.eup %4103 }
 0xeb1   :  { %v2204_v7 = vsel %vm208_vm1, %v4104_v5, 0.0  ;;  %v4106_v9 = vpop.eup %4105 }
 0xeb2   :  { %2205 = vadd.xlane.f32.xlu0 %v2204_v7  ;;  %v2201_v13 = vsel %vm208_vm1, %v4106_v9, 0.0 }
 0xebb   :  { %4033 = vrot.lane.b32.xlu1 %v4557_v54, %s4195_s23 }
 0xebf   :  { %4038 = vrot.lane.b32.xlu1 %v4569_v58, %s4191_s19 }
 0xec8   :  { %4028 = vrot.lane.b32.xlu0 %v4569_v58, %s4194_s22 }
 0xecc   :  { %2300 = vrot.lane.b32.xlu0 %v4559_v55, %s4193_s21 }
 0xee3   :  { %2202 = vadd.xlane.f32.xlu1 %v2201_v13 }
 0xef4   :  { %2298 = vrot.lane.b32.xlu1 %v4561_v57, %s4193_s21 }
 0xf32   :  { %v1804_v54 = vpop.xlane.xlu0 %1803 }
 0xf33   :  { %4107 = vrcp.f32 %v1804_v54  ;;  %v1801_v14 = vpop.xlane.xlu1 %1800 }
 0xf34   :  { %4109 = vrcp.f32 %v1801_v14 }
 0xf37   :  { %v2001_v10 = vpop.xlane.xlu1 %2000 }
 0xf38   :  { %4111 = vrcp.f32 %v2001_v10 }
 0xf3b   :  { %v2004_v15 = vpop.xlane.xlu0 %2003  ;;  %v4034_v23 = vpop.permute.xlu1 %4033 }
 0xf3c   :  { %4113 = vrcp.f32 %v2004_v15  ;;  %v4036_v31 = vunpack.i.h.bf16 %v4034_v23  ;;  %v4035_v32 = vunpack.i.l.bf16 %v4034_v23 }
 0xf3d   :  { %v4108_v16 = vpop.eup %4107 }
 0xf3e   :  { %v4110_v19 = vpop.eup %4109  ;;  %v1808_v22 = vmul.f32 %v4108_v16, %v4096_v56  ;;  %v3888_v39 = vpack.c.bf16 %v4036_v31, %v4035_v32  ;;  %v3275_v31 = vld [vmem:[%s4772_s3 + $0x28] sm:$0xff] }
 0xf3f   :  { %v1806_v55 = vmul.f32 %v4110_v19, %v4098_v59  ;;  %v2206_v24 = vpop.xlane.xlu0 %2205  ;;  %v4039_v35 = vpop.permute.xlu1 %4038  ;;  %v3276_v19 = vld [vmem:[%s4772_s3 + $0x30] sm:$0xff] }
 0xf40   :  { %v4041_v21 = vunpack.i.h.bf16 %v4039_v35  ;;  %v4040_v17 = vunpack.i.l.bf16 %v4039_v35  ;;  %4115 = vrcp.f32 %v2206_v24 }
 0xf41   :  { %3651 = vmatprep.mubr.msk.f32.mxu0 %vm208_vm1, %v1806_v55  ;;  %v3277_v55 = vld [vmem:[%s4772_s3 + $0x38] sm:$0xff] }
 0xf42   :  { %v4112_v27 = vpop.eup %4111  ;;  %3652 = vmatmul.mubr.msk.f32.vlgmr.msra.gmra.mrb[20].mxu0 %vm208_vm1, %v1808_v22  ;;  %v3892_v42 = vpack.c.bf16 %v4041_v21, %v4040_v17  ;;  %v3902_v22 = vpack.c.bf16 %v3277_v55, %v3276_v19  ;;  %v3283_v19 = vld [vmem:[%s4775_s6 + $0x40] sm:$0xff]  ;;  %v3284_v55 = vld [vmem:[%s4775_s6 + $0x48] sm:$0xff] }
 0xf43   :  { %v2006_v57 = vmul.f32 %v4112_v27, %v4100_v1  ;;  %v4029_v30 = vpop.permute.xlu0 %4028 }
 0xf44   :  { %v4031_v33 = vunpack.i.h.bf16 %v4029_v30  ;;  %v4030_v34 = vunpack.i.l.bf16 %v4029_v30  ;;  %v3274_v30 = vld [vmem:[%s4772_s3 + $0x20] sm:$0xff] }
 0xf45   :  { %3665 = vmatprep.mubr.msk.f32.mxu0 %vm208_vm1, %v2006_v57 }
 0xf46   :  { %v3878_v36 = vpack.c.bf16 %v4031_v33, %v4030_v34  ;;  %v4114_v38 = vpop.eup %4113  ;;  %v3906_v34 = vpack.c.bf16 %v3275_v31, %v3274_v30 }
 0xf47   :  { %v2008_v40 = vmul.f32 %v4114_v38, %v4102_v3  ;;  %v2301_v53 = vpop.permute.xlu0 %2300  ;;  %v4661_v38 = vld [vmem:[%s4776_s7 + $0x8] sm:$0x3f] }
 0xf48   :  { %3879 = vmatprep.subr.bf16.mxu0 %v3878_v36 }
 0xf49   :  { %3881 = vmatpush3.bf16.msra.mxu0 %v3878_v36 }
 0xf4a   :  { %3889 = vmatprep.subr.bf16.mxu0 %v3888_v39  ;;  %v4116_v48 = vpop.eup %4115 }
 0xf4b   :  { %v2210_v51 = vmul.f32 %v4116_v48, %v4104_v5 }
 0xf4c   :  { %3666 = vmatmul.mubr.msk.f32.vlgmr.msra.gmra.mrb[22].mxu0 %vm208_vm1, %v2008_v40 }
 0xf4d   :  { %3891 = vmatpush3.bf16.msra.mxu0 %v3888_v39  ;;  %v2697_v39 = vrot.slane %v4661_v38, %v1203_v47 }
 0xf4e   :  { %3894 = vmatprep.subr.msk.bf16.mxu0 %vm4342_vm2, %v3892_v42 }
 0xf70   :  { %v2203_v44 = vpop.xlane.xlu1 %2202 }
 0xf71   :  { %4117 = vrcp.f32 %v2203_v44 }
 0xf74   :  { %v2299_v52 = vpop.permute.xlu1 %2298 }
 0xf7b   :  { %v4118_v49 = vpop.eup %4117 }
 0xf7c   :  { %v2208_v50 = vmul.f32 %v4118_v49, %v4106_v9 }
 0xf7e   :  { %3679 = vmatprep.mubr.msk.f32.mxu0 %vm208_vm1, %v2208_v50 }
 0xf7f   :  { %3680 = vmatmul.mubr.msk.f32.vlgmr.msra.gmra.mrb[24].mxu0 %vm208_vm1, %v2210_v51 }
 0xf80   :  { %3897 = vmatpush3.bf16.xpose.msk.msra.mxu0 %vm4342_vm2, %v3892_v42  ;;  %3686 = vmatprep.mubr.msk.f32.mxu0 %vm208_vm1, %v2299_v52 }
 0xf87   :  { %3687 = vmatmul.mubr.msk.f32.vlgmr.msra.gmra.mrb[26].mxu0 %vm208_vm1, %v2301_v53 }
0x1015   :  { %v3653_v56 = vpop.f32.mrb[20].mxu0 }
0x1016   :  { %v1887_v59 = vpop.f32.mrb[21].mxu0 }
0x101f   :  { %v3667_v60 = vpop.f32.mrb[22].mxu0 }
0x1020   :  { %v2087_v61 = vpop.f32.mrb[23].mxu0 }
0x1052   :  { %v3681_v62 = vpop.f32.mrb[24].mxu0 }
0x1053   :  { %v2289_v63 = vpop.f32.mrb[25].mxu0 }
0x105a   :  { %v3688_v8 = vpop.f32.mrb[26].mxu0 }
0x105b   :  { %v2390_v0 = vmul.f32 0.25, %v3688_v8  ;;  %v2380_v1 = vpop.f32.mrb[27].mxu0 }
0x105c   :  { %v2389_v2 = vmul.f32 0.25, %v2380_v1 }
0x105d   :  { %v2394_v6 = vsel %vm208_vm1, %v2390_v0, -inf }
0x105e   :  { %2395 = vmax.xlane.f32.xlu0 %v2394_v6  ;;  %v2391_v26 = vsel %vm208_vm1, %v2389_v2, -inf }
0x105f   :  { %2392 = vmax.xlane.f32.xlu1 %v2391_v26 }
0x1070   :  { %4043 = vrot.lane.b32.xlu1 %v4569_v58, %s4195_s23 }
0x10eb   :  { %v2396_v3 = vpop.xlane.xlu0 %2395 }
0x10ec   :  { %v2398_v4 = vsub.f32 %v2390_v0, %v2396_v3  ;;  %v2393_v5 = vpop.xlane.xlu1 %2392 }
0x10ed   :  { %v2397_v7 = vsub.f32 %v2389_v2, %v2393_v5 }
0x10ee   :  { %v2401_v11 = vmul.f32 1.442695, %v2398_v4 }
0x10ef   :  { %v2399_v12 = vmul.f32 1.442695, %v2397_v7 }
0x10f0   :  { %v4044_v9 = vpop.permute.xlu1 %4043 }
0x10f1   :  { %4119 = vpow2.f32 %v2399_v12  ;;  %v4046_v13 = vunpack.i.h.bf16 %v4044_v9  ;;  %v4045_v54 = vunpack.i.l.bf16 %v4044_v9 }
0x10f2   :  { %4121 = vpow2.f32 %v2401_v11 }
0x10f3   :  { %v3898_v14 = vpack.c.bf16 %v4046_v13, %v4045_v54  ;;  %v3278_v54 = vld [vmem:[%s4773_s4 + $0x20] sm:$0xff] }
0x10f5   :  { %3899 = vmatprep.subr.bf16.mxu1 %v3898_v14 }
0x10f6   :  { %3901 = vmatpush3.bf16.msra.mxu1 %v3898_v14  ;;  %v3279_v14 = vld [vmem:[%s4773_s4 + $0x28] sm:$0xff] }
0x10f7   :  { %3903 = vmatprep.subr.bf16.mxu1 %v3902_v22 }
0x10fb   :  { %v4120_v10 = vpop.eup %4119 }
0x10fc   :  { %v2403_v15 = vsel %vm208_vm1, %v4120_v10, 0.0  ;;  %v4122_v16 = vpop.eup %4121 }
0x10fd   :  { %2404 = vadd.xlane.f32.xlu0 %v2403_v15  ;;  %v2406_v58 = vsel %vm208_vm1, %v4122_v16, 0.0  ;;  %v3280_v15 = vld [vmem:[%s4773_s4 + $0x30] sm:$0xff] }
0x1101   :  { %2407 = vadd.xlane.f32.xlu0 %v2406_v58 }
0x118a   :  { %v2405_v23 = vpop.xlane.xlu0 %2404 }
0x118b   :  { %4123 = vrcp.f32 %v2405_v23 }
0x118e   :  { %v2408_v24 = vpop.xlane.xlu0 %2407 }
0x118f   :  { %4125 = vrcp.f32 %v2408_v24 }
0x1195   :  { %v4124_v27 = vpop.eup %4123 }
0x1196   :  { %v2410_v57 = vmul.f32 %v4124_v27, %v4120_v10  ;;  %v3910_v10 = vpack.c.bf16 %v3279_v14, %v3278_v54 }
0x1198   :  { %3693 = vmatprep.mubr.msk.f32.mxu1 %vm208_vm1, %v2410_v57  ;;  %3911 = vmatprep.subr.bf16.mxu0 %v3910_v10 }
0x1199   :  { %v4126_v32 = vpop.eup %4125  ;;  %3913 = vmatpush3.bf16.msra.mxu0 %v3910_v10  ;;  %v2884_v10 = vrot.slane %v4661_v38, %v1391_v29 }
0x119a   :  { %v2412_v33 = vmul.f32 %v4126_v32, %v4122_v16  ;;  %v3281_v16 = vld [vmem:[%s4773_s4 + $0x38] sm:$0xff] }
0x119b   :  { %v3914_v58 = vpack.c.bf16 %v3281_v16, %v3280_v15 }
0x119c   :  { %3694 = vmatmul.mubr.msk.f32.vlgmr.msra.gmra.mrb[22].mxu1 %vm208_vm1, %v2412_v33 }
0x119d   :  { %3905 = vmatpush3.bf16.msra.mxu1 %v3902_v22  ;;  %3700 = vmatprep.mubr.msk.f32.mxu1 %vm208_vm1, %v2289_v63  ;;  %v3918_v22 = vpack.c.bf16 %v3284_v55, %v3283_v19 }
0x119e   :  { %3907 = vmatprep.subr.bf16.mxu1 %v3906_v34  ;;  %3915 = vmatprep.subr.bf16.mxu0 %v3914_v58 }
0x119f   :  { %3917 = vmatpush3.bf16.msra.mxu0 %v3914_v58 }
0x11a0   :  { %3701 = vmatmul.mubr.msk.f32.vlgmr.msra.gmra.mrb[24].mxu1 %vm208_vm1, %v3681_v62  ;;  %3919 = vmatprep.subr.bf16.mxu0 %v3918_v22 }
0x11a1   :  { %3909 = vmatpush3.bf16.msra.mxu1 %v3906_v34 }
0x126f   :  { %v3695_v35 = vpop.f32.mrb[22].mxu1 }
0x1270   :  { %v2491_v36 = vpop.f32.mrb[23].mxu1 }
0x1271   :  { %3703 = vmatprep.mubr.msk.f32.mxu1 %vm208_vm1, %v2491_v36 }
0x1272   :  { %3704 = vmatmul.mubr.msk.f32.gmra.mrb[26].mxu1 %vm208_vm1, %v3695_v35 }
0x1273   :  { %3710 = vmatprep.mubr.msk.f32.mxu1 %vm208_vm1, %v1887_v59 }
0x1276   :  { %3711 = vmatmul.mubr.msk.f32.vlgmr.msra.gmra.mrb[24].mxu1 %vm208_vm1, %v3653_v56 }
0x1277   :  { %3713 = vmatprep.mubr.msk.f32.mxu1 %vm208_vm1, %v2087_v61 }
0x127a   :  { %3714 = vmatmul.mubr.msk.f32.gmra.mrb[26].mxu1 %vm208_vm1, %v3667_v60 }
0x1349   :  { %v3712_v21 = vpop.f32.mrb[24].mxu1 }
0x134a   :  { %v2699_v17 = vadd.f32 %v3712_v21, %v2697_v39  ;;  %v2675_v40 = vpop.f32.mrb[25].mxu1 }
0x134b   :  { %v2698_v42 = vadd.f32 %v2697_v39, %v2675_v40  ;;  %v2761_v40 = vrot.slane %v4661_v38, %v1268_v43 }
0x134c   :  { %v2703_v44 = vadd.f32 %v2699_v17, %v4543_v18 }
0x134d   :  { %v3715_v48 = vpop.f32.mrb[26].mxu1  ;;  %v2702_v51 = vadd.f32 %v2698_v42, %v4537_v37 }
0x134e   :  { %v2685_v49 = vpop.f32.mrb[27].mxu1  ;;  %v2709_v50 = vsel %vm104_vm0, %v2703_v44, 0.0  ;;  %v2701_v53 = vadd.f32 %v3715_v48, %v2697_v39  ;;  %v2769_v48 = vrot.slane %v4661_v38, %v1276_v45  ;;  %v3287_v45 = vld [vmem:[%s4775_s6 + $0x60] sm:$0xff] }
0x134f   :  { %v2700_v52 = vadd.f32 %v2697_v39, %v2685_v49  ;;  %2710 = vadd.xlane.f32.xlu0 %v2709_v50  ;;  %v2706_v56 = vsel %vm104_vm0, %v2702_v51, 0.0 }
0x1350   :  { %v2705_v60 = vadd.f32 %v2701_v53, %v4549_v20 }
0x1351   :  { %v2704_v59 = vadd.f32 %v2700_v52, %v4541_v41  ;;  %v3286_v52 = vld [vmem:[%s4775_s6 + $0x58] sm:$0xff] }
0x1352   :  { %v2715_v18 = vsel %vm104_vm0, %v2705_v60, 0.0 }
0x1353   :  { %2707 = vadd.xlane.f32.xlu0 %v2706_v56  ;;  %v2712_v47 = vsel %vm104_vm0, %v2704_v59, 0.0 }
0x1357   :  { %2713 = vadd.xlane.f32.xlu0 %v2712_v47 }
0x135b   :  { %2716 = vadd.xlane.f32.xlu0 %v2715_v18  ;;  %v3288_v18 = vld [vmem:[%s4775_s6 + $0x68] sm:$0xff] }
0x13dc   :  { %v2711_v61 = vpop.xlane.xlu0 %2710 }
0x13dd   :  { %v2719_v62 = vmul.f32 0.03125, %v2711_v61 }
0x13df   :  { %v2723_v63 = vsub.f32 %v2703_v44, %v2719_v62 }
0x13e0   :  { %v2708_v37 = vpop.xlane.xlu0 %2707 }
0x13e1   :  { %v2718_v8 = vmul.f32 0.03125, %v2708_v37  ;;  %v2727_v0 = vmul.f32 %v2723_v63, %v2723_v63  ;;  %v3926_v37 = vpack.c.bf16 %v3288_v18, %v3287_v45 }
0x13e3   :  { %v2722_v1 = vsub.f32 %v2702_v51, %v2718_v8  ;;  %v2733_v2 = vsel %vm104_vm0, %v2727_v0, 0.0  ;;  %v3285_v51 = vld [vmem:[%s4775_s6 + $0x50] sm:$0xff] }
0x13e4   :  { %2734 = vadd.xlane.f32.xlu0 %v2733_v2  ;;  %v2714_v41 = vpop.xlane.xlu0 %2713  ;;  %v3922_v47 = vpack.c.bf16 %v3286_v52, %v3285_v51  ;;  %v3290_v2 = vld [vmem:[%s4775_s6 + $0x78] sm:$0xff]  ;;  %v3122_v51 = vld [vmem:[%s4779_s10 + $0x8] sm:$0xff] }
0x13e5   :  { %v2720_v6 = vmul.f32 0.03125, %v2714_v41  ;;  %v2726_v26 = vmul.f32 %v2722_v1, %v2722_v1 }
0x13e7   :  { %v2724_v3 = vsub.f32 %v2704_v59, %v2720_v6  ;;  %v2730_v20 = vsel %vm104_vm0, %v2726_v26, 0.0  ;;  %v3329_v6 = vld [vmem:[%s4774_s5 + $0x1] ss:$0 sm:$0xff] }
0x13e8   :  { %2731 = vadd.xlane.f32.xlu1 %v2730_v20  ;;  %v2717_v4 = vpop.xlane.xlu0 %2716 }
0x13e9   :  { %v2721_v5 = vmul.f32 0.03125, %v2717_v4  ;;  %v2728_v7 = vmul.f32 %v2724_v3, %v2724_v3 }
0x13eb   :  { %v2725_v11 = vsub.f32 %v2705_v60, %v2721_v5  ;;  %v2736_v12 = vsel %vm104_vm0, %v2728_v7, 0.0 }
0x13ec   :  { %2737 = vadd.xlane.f32.xlu0 %v2736_v12 }
0x13ed   :  { %v2729_v9 = vmul.f32 %v2725_v11, %v2725_v11 }
0x13ef   :  { %v2739_v13 = vsel %vm104_vm0, %v2729_v9, 0.0 }
0x13f0   :  { %2740 = vadd.xlane.f32.xlu0 %v2739_v13 }
0x1471   :  { %v2735_v23 = vpop.xlane.xlu0 %2734 }
0x1472   :  { %v2743_v24 = vmul.f32 0.03125, %v2735_v23 }
0x1474   :  { %v2747_v27 = vadd.f32 1e-05, %v2743_v24 }
0x1475   :  { %v2732_v57 = vpop.xlane.xlu1 %2731 }
0x1476   :  { %4127 = vrsqrt.f32 %v2747_v27  ;;  %v2742_v30 = vmul.f32 0.03125, %v2732_v57 }
0x1478   :  { %v2746_v31 = vadd.f32 1e-05, %v2742_v30 }
0x1479   :  { %v2738_v32 = vpop.xlane.xlu0 %2737 }
0x147a   :  { %4129 = vrsqrt.f32 %v2746_v31  ;;  %v2744_v33 = vmul.f32 0.03125, %v2738_v32 }
0x147c   :  { %v2748_v34 = vadd.f32 1e-05, %v2744_v33 }
0x147d   :  { %v2741_v35 = vpop.xlane.xlu0 %2740 }
0x147e   :  { %4131 = vrsqrt.f32 %v2748_v34  ;;  %v2745_v36 = vmul.f32 0.03125, %v2741_v35 }
0x1480   :  { %v4128_v39 = vpop.eup %4127  ;;  %v2749_v21 = vadd.f32 1e-05, %v2745_v36 }
0x1481   :  { %v2755_v17 = vmul.f32 %v4128_v39, %v2723_v63 }
0x1482   :  { %4133 = vrsqrt.f32 %v2749_v21 }
0x1483   :  { %v2763_v49 = vmul.f32 %v2761_v40, %v2755_v17  ;;  %v3028_v17 = vld [vmem:[#allocation5] sm:$0xff] }
0x1484   :  { %v4130_v42 = vpop.eup %4129 }
0x1485   :  { %v2754_v44 = vmul.f32 %v4130_v42, %v2722_v1  ;;  %v2771_v43 = vadd.f32 %v2769_v48, %v2763_v49  ;;  %v3289_v1 = vld [vmem:[%s4775_s6 + $0x70] sm:$0xff] }
0x1486   :  { %v3930_v41 = vpack.c.bf16 %v3290_v2, %v3289_v1 }
0x1487   :  { %v2762_v50 = vmul.f32 %v2761_v40, %v2754_v44  ;;  %v3030_v44 = vld [vmem:[#allocation5 + $0x10] sm:$0xff] }
0x1488   :  { %v4132_v53 = vpop.eup %4131 }
0x1489   :  { %v2770_v56 = vadd.f32 %v2769_v48, %v2762_v50  ;;  %v2756_v59 = vmul.f32 %v4132_v53, %v2724_v3  ;;  %v3121_v50 = vld [vmem:[%s4779_s10] sm:$0xff] }
0x148a   :  { %v3942_v52 = vpack.c.bf16 %v3122_v51, %v3121_v50 }
0x148b   :  { %3724 = vmatprep.mubr.msk.f32.mxu0 %vm104_vm0, %v2770_v56  ;;  %v2764_v60 = vmul.f32 %v2761_v40, %v2756_v59 }
0x148c   :  { %v4134_v61 = vpop.eup %4133  ;;  %3725 = vmatmul.mubr.msk.f32.vlgmr.msra.gmra.mrb[28].mxu0 %vm104_vm0, %v2771_v43 }
0x148d   :  { %v2772_v62 = vadd.f32 %v2769_v48, %v2764_v60  ;;  %v2757_v63 = vmul.f32 %v4134_v61, %v2725_v11  ;;  %3921 = vmatpush3.bf16.msra.mxu0 %v3918_v22  ;;  %v3011_v61 = vrot.slane %v4661_v38, %v1549_v25  ;;  %v3124_v25 = vld [vmem:[%s4779_s10 + $0x18] sm:$0xff] }
0x148e   :  { %3923 = vmatprep.subr.bf16.mxu0 %v3922_v47 }
0x148f   :  { %3727 = vmatprep.mubr.msk.f32.mxu0 %vm104_vm0, %v2772_v62  ;;  %v2765_v8 = vmul.f32 %v2761_v40, %v2757_v63  ;;  %v3029_v40 = vld [vmem:[#allocation5 + $0x8] sm:$0xff]  ;;  %v3017_v63 = vrot.slane %v4661_v38, %v1557_v28  ;;  %v3946_v28 = vpack.c.bf16 %v3124_v25, %v3123_v46  ;;  %v3338_v38 = vld [vmem:[%s4778_s9] ss:$0 sm:$0xff] }
0x1490   :  { %v3934_v42 = vpack.c.bf16 %v3029_v40, %v3028_v17 }
0x1491   :  { %v2773_v0 = vadd.f32 %v2769_v48, %v2765_v8  ;;  %3925 = vmatpush3.bf16.msra.mxu0 %v3922_v47  ;;  %v3031_v48 = vld [vmem:[#allocation5 + $0x18] sm:$0xff] }
0x1492   :  { %3927 = vmatprep.subr.bf16.mxu0 %v3926_v37  ;;  %v3938_v49 = vpack.c.bf16 %v3031_v48, %v3030_v44  ;;  %3935 = vmatprep.subr.bf16.mxu1 %v3934_v42 }
0x1493   :  { %3728 = vmatmul.mubr.msk.f32.gmra.mrb[30].mxu0 %vm104_vm0, %v2773_v0  ;;  %3937 = vmatpush3.bf16.msra.mxu1 %v3934_v42 }
0x1494   :  { %3939 = vmatprep.subr.bf16.mxu1 %v3938_v49 }
0x1495   :  { %3929 = vmatpush3.bf16.msra.mxu0 %v3926_v37 }
0x1496   :  { %3931 = vmatprep.subr.bf16.mxu0 %v3930_v41 }
0x1497   :  { %3941 = vmatpush3.bf16.msra.mxu1 %v3938_v49 }
0x1498   :  { %3943 = vmatprep.subr.bf16.mxu1 %v3942_v52 }
0x1499   :  { %3933 = vmatpush3.bf16.msra.mxu0 %v3930_v41 }
0x155f   :  { %v3726_v26 = vpop.f32.mrb[28].mxu0 }
0x1560   :  { %v2864_v3 = vadd.f32 %v3726_v26, %v3329_v6  ;;  %v2858_v20 = vpop.f32.mrb[29].mxu0 }
0x1561   :  { %v2859_v4 = vadd.f32 %v3329_v6, %v2858_v20 }
0x1562   :  { %v2878_v7 = vmax.f32 %v2864_v3, 0.0 }
0x1563   :  { %v2877_v5 = vmax.f32 %v2859_v4, 0.0 }
0x1565   :  { %3746 = vmatprep.mubr.msk.f32.mxu0 %vm1393_vm3, %v2877_v5 }
0x1566   :  { %v3729_v11 = vpop.f32.mrb[30].mxu0  ;;  %3747 = vmatmul.mubr.msk.f32.vlgmr.msra.gmra.mrb[32].mxu0 %vm1393_vm3, %v2878_v7 }
0x1567   :  { %v2874_v12 = vadd.f32 %v3729_v11, %v3329_v6  ;;  %v2868_v9 = vpop.f32.mrb[31].mxu0 }
0x1568   :  { %v2869_v13 = vadd.f32 %v3329_v6, %v2868_v9 }
0x1569   :  { %v2880_v14 = vmax.f32 %v2874_v12, 0.0  ;;  %v3341_v12 = vld [vmem:[#allocation2] ss:$0 sm:$0xff] }
0x156a   :  { %v2879_v54 = vmax.f32 %v2869_v13, 0.0 }
0x156c   :  { %3749 = vmatprep.mubr.msk.f32.mxu0 %vm1393_vm3, %v2879_v54 }
0x156d   :  { %3750 = vmatmul.mubr.msk.f32.gmra.mrb[34].mxu0 %vm1393_vm3, %v2880_v14 }
0x1639   :  { %v3748_v15 = vpop.f32.mrb[32].mxu0 }
0x163a   :  { %v2968_v16 = vadd.f32 %v3748_v15, %v2884_v10  ;;  %v2963_v58 = vpop.f32.mrb[33].mxu0 }
0x163c   :  { %v2980_v19 = vadd.f32 %v2968_v16, %v2771_v43 }
0x163e   :  { %v2982_v55 = vsel %vm104_vm0, %v2980_v19, 0.0 }
0x163f   :  { %2983 = vadd.xlane.f32.xlu0 %v2982_v55 }
0x1640   :  { %v3751_v22 = vpop.f32.mrb[34].mxu0 }
0x1641   :  { %v2977_v23 = vadd.f32 %v3751_v22, %v2884_v10  ;;  %v2972_v24 = vpop.f32.mrb[35].mxu0 }
0x1643   :  { %v2981_v27 = vadd.f32 %v2977_v23, %v2773_v0 }
0x1645   :  { %v2985_v57 = vsel %vm104_vm0, %v2981_v27, 0.0 }
0x1646   :  { %2986 = vadd.xlane.f32.xlu0 %v2985_v57 }
0x16cc   :  { %v2984_v30 = vpop.xlane.xlu0 %2983 }
0x16cd   :  { %v2988_v31 = vmul.f32 0.03125, %v2984_v30 }
0x16cf   :  { %v2990_v32 = vsub.f32 %v2980_v19, %v2988_v31 }
0x16d1   :  { %v2992_v33 = vmul.f32 %v2990_v32, %v2990_v32 }
0x16d3   :  { %v2987_v34 = vpop.xlane.xlu0 %2986  ;;  %v2994_v29 = vsel %vm104_vm0, %v2992_v33, 0.0 }
0x16d4   :  { %v2989_v35 = vmul.f32 0.03125, %v2987_v34  ;;  %2995 = vadd.xlane.f32.xlu0 %v2994_v29 }
0x16d6   :  { %v2991_v36 = vsub.f32 %v2981_v27, %v2989_v35 }
0x16d8   :  { %v2993_v39 = vmul.f32 %v2991_v36, %v2991_v36 }
0x16da   :  { %v2997_v21 = vsel %vm104_vm0, %v2993_v39, 0.0 }
0x16db   :  { %2998 = vadd.xlane.f32.xlu0 %v2997_v21 }
0x1761   :  { %v2996_v53 = vpop.xlane.xlu0 %2995 }
0x1762   :  { %v3000_v56 = vmul.f32 0.03125, %v2996_v53 }
0x1764   :  { %v3002_v59 = vadd.f32 1e-05, %v3000_v56 }
0x1766   :  { %4135 = vrsqrt.f32 %v3002_v59 }
0x1768   :  { %v2999_v43 = vpop.xlane.xlu0 %2998 }
0x1769   :  { %v3001_v47 = vmul.f32 0.03125, %v2999_v43 }
0x176b   :  { %v3003_v60 = vadd.f32 1e-05, %v3001_v47 }
0x176d   :  { %4137 = vrsqrt.f32 %v3003_v60 }
0x1770   :  { %v4136_v45 = vpop.eup %4135 }
0x1771   :  { %v3006_v18 = vmul.f32 %v4136_v45, %v2990_v32 }
0x1773   :  { %v3012_v62 = vmul.f32 %v3011_v61, %v3006_v18 }
0x1775   :  { %v3018_v1 = vadd.f32 %v3017_v63, %v3012_v62 }
0x1777   :  { %v4138_v37 = vpop.eup %4137  ;;  %v3021_v41 = vrot.slane %v3018_v1, 2 }
0x1778   :  { %v3007_v8 = vmul.f32 %v4138_v37, %v2991_v36 }
0x177a   :  { %v3013_v0 = vmul.f32 %v3011_v61, %v3007_v8 }
0x177c   :  { %v3019_v2 = vadd.f32 %v3017_v63, %v3013_v0 }
0x177e   :  { %v3024_v6 = vrot.slane %v3019_v2, 4 }
0x1780   :  { %v3027_v26 = vsel %vm3026_vm4, %v3021_v41, %v3024_v6 }
0x1781   :  { %3760 = vmatprep.mubr.msk.f32.mxu1 %vm104_vm0, %v3027_v26 }
0x1782   :  { %3761 = vmatmul.mubr.msk.f32.vlgmr.msra.gmra.mrb[28].mxu1 %vm104_vm0, %v3024_v6 }
0x1783   :  { %3945 = vmatpush3.bf16.msra.mxu1 %v3942_v52 }
0x1784   :  { %3947 = vmatprep.subr.bf16.mxu1 %v3946_v28 }
0x1787   :  { %3949 = vmatpush3.bf16.msra.mxu1 %v3946_v28 }
0x1855   :  { %v3762_v3 = vpop.f32.mrb[28].mxu1 }
0x1856   :  { %v3116_v20 = vadd.f32 %v3762_v3, %v3338_v38  ;;  %v3110_v4 = vpop.f32.mrb[29].mxu1 }
0x1857   :  { %v3111_v5 = vadd.f32 %v3338_v38, %v3110_v4 }
0x1858   :  { %v3120_v11 = vmax.f32 %v3116_v20, 0.0 }
0x1859   :  { %v3119_v7 = vmax.f32 %v3111_v5, 0.0 }
0x185b   :  { %3771 = vmatprep.mubr.msk.f32.mxu1 %vm104_vm0, %v3119_v7 }
0x185c   :  { %3772 = vmatmul.mubr.msk.f32.vlgmr.msra.gmra.mrb[30].mxu1 %vm104_vm0, %v3120_v11 }
0x192f   :  { %v3773_v9 = vpop.f32.mrb[30].mxu1 }
0x1930   :  { %v3210_v13 = vadd.f32 %v3773_v9, %v3341_v12  ;;  %v3204_v54 = vpop.f32.mrb[31].mxu1 }
0x1931   :  { %v3205_v14 = vadd.f32 %v3341_v12, %v3204_v54 }
0x1932   :  { %3216 = vst.msk [vmem:[%s4781_s12 + $0x8] sm:$0xf] %vm3215_vm5, %v3210_v13 }
0x1933   :  { %3214 = vst.msk [vmem:[%s4781_s12] sm:$0xff] %vm3213_vm6, %v3205_v14 }
0x1934   :  { %3221 = vsyncpa [#allocation4], 1 }
0x1935   :  { %3222 = vsyncpa [#allocation6], 1 }

</bundles_post_ra>
